<compile_context>
chip_gen: v5e
topology: v5e:2x2
jax: 0.10.0
libtpu: 0.0.40
codegen_flags: <defaults>
</compile_context>

<pallas_src>
import functools
import math

import jax
import jax.numpy as jnp
from jax.experimental import pallas as pl
from jax.experimental.pallas import tpu as pltpu

LANE = 128  # TPU lane width; pad minor dims to this for unmasked, lane-dense ops.


def _round_up(x, m):
    return ((x + m - 1) // m) * m


# ----------------------------------------------------------------------------
# Fused Pallas kernel: conv(+relu, channel-sum) + max-pool for every filter
# size, plus the final Linear, in one invocation over the whole batch.
# ----------------------------------------------------------------------------
def _fused_cnn_kernel(*refs, filter_sizes, n_ch, B, L, f_pad):
    n_fs = len(filter_sizes)
    emb_ref = refs[0]                                # (n_ch, B*L, D_pad) f32
    conv_w_refs = refs[1:1 + n_fs]                   # (fs*D_pad, F_pad) bf16
    conv_b_refs = refs[1 + n_fs:1 + 2 * n_fs]        # (1, F_pad) f32
    fcw_ref, fcb_ref, out_ref = refs[1 + 2 * n_fs:]  # (n_fs*F_pad, O_pad), (1, O_pad), (B, O_pad)

    o_pad = out_ref.shape[-1]

    # Load each embedding channel once; reused by every filter size.
    emb_ch = [emb_ref[c] for c in range(n_ch)]       # (B*L, D_pad) f32 each

    out = jnp.zeros((B, o_pad), dtype=jnp.float32)
    for i, fs in enumerate(filter_sizes):
        L_out = L - fs + 1
        # Convolve over the flattened (B*L) time axis; windows that straddle a
        # batch boundary are computed but never pooled.
        M = B * L - fs + 1
        conved = jnp.zeros((M, f_pad), dtype=jnp.float32)
        for c in range(n_ch):
            # im2col: K = fs*D_pad -> a single MXU matmul per (channel, fs).
            cols = jnp.concatenate(
                [emb_ch[c][k:k + M, :] for k in range(fs)], axis=-1)
            acc = jnp.dot(cols.astype(jnp.bfloat16), conv_w_refs[i][...],
                          preferred_element_type=jnp.float32)     # (M, F_pad)
            acc = acc + conv_b_refs[i][...]
            # Reference: ReLU per embedding channel, THEN sum over channels.
            conved = conved + jnp.maximum(acc, 0.0)
        # Max-pool over time, per batch element (only in-batch windows).
        pooled = jnp.concatenate(
            [jnp.max(conved[b * L:b * L + L_out, :], axis=0, keepdims=True)
             for b in range(B)], axis=0)                           # (B, F_pad)
        # Partial FC per filter size (avoids a narrow lane-concat of features).
        out = out + jnp.dot(pooled, fcw_ref[i * f_pad:(i + 1) * f_pad, :],
                            preferred_element_type=jnp.float32)
    # TODO(synk): dropout == identity (eval mode).
    out_ref[...] = out + fcb_ref[...]


# ----------------------------------------------------------------------------
# Wrapper: packing / padding to kernel layouts + the single pallas_call.
# ----------------------------------------------------------------------------
def cnn1d_forward(params, text, *, filter_sizes):
    """text: (B, L) int32 -> logits (B, output_dim)."""
    B, L = text.shape
    n_ch = len(params["embeddings"])
    D = params["embeddings"][0].shape[1]
    F = params["convs"][0][0].shape[-1]
    O = params["fc_w"].shape[-1]

    d_pad = _round_up(D, LANE)
    f_pad = _round_up(F, LANE)
    o_pad = _round_up(O, LANE)

    # Embedding lookup (gather) is glue; done in plain JAX.
    # TODO(synk): at production vocab/L, fuse the gather into the kernel via
    # PrefetchScalarGridSpec so the stacked embeddings never round-trip HBM.
    emb = jnp.stack([e[text] for e in params["embeddings"]], axis=0)  # (n_ch,B,L,D)
    emb = jnp.pad(emb, ((0, 0), (0, 0), (0, 0), (0, d_pad - D)))
    emb = emb.reshape(n_ch, B * L, d_pad).astype(jnp.float32)

    conv_ws, conv_bs = [], []
    for fs, (w, b) in zip(filter_sizes, params["convs"]):
        # w: (fs, D, F) -> pad D->d_pad, F->f_pad -> flatten taps into K (tap-major).
        wp = jnp.pad(w, ((0, 0), (0, d_pad - D), (0, f_pad - F)))
        conv_ws.append(wp.reshape(fs * d_pad, f_pad).astype(jnp.bfloat16))
        conv_bs.append(jnp.pad(b, ((0, 0), (0, f_pad - F))).astype(jnp.float32))

    # fc_w: (len(fs)*F, O) -> per-filter-size 128-row blocks, zero padded.
    fcw = params["fc_w"].reshape(len(filter_sizes), F, O)
    fcw = jnp.pad(fcw, ((0, 0), (0, f_pad - F), (0, o_pad - O)))
    fcw = fcw.reshape(len(filter_sizes) * f_pad, o_pad).astype(jnp.float32)
    fcb = jnp.pad(params["fc_b"], ((0, 0), (0, o_pad - O))).astype(jnp.float32)

    kernel = functools.partial(_fused_cnn_kernel,
                               filter_sizes=tuple(filter_sizes),
                               n_ch=n_ch, B=B, L=L, f_pad=f_pad)

    out_padded = pl.pallas_call(
        kernel,
        out_shape=jax.ShapeDtypeStruct((B, o_pad), jnp.float32),
        # No grid: every operand fits easily in VMEM at these sizes, so a
        # single step over the whole batch removes all grid-step overhead.
        compiler_params=pltpu.CompilerParams(
            vmem_limit_bytes=32 * 1024 * 1024),
    )(emb, *conv_ws, *conv_bs, fcw, fcb)

    return out_padded[:, :O]


# ----------------------------------------------------------------------------
# Parameter construction (logical shapes; packing happens in the wrapper).
# ----------------------------------------------------------------------------
def init_params(key, *, model_type, vocab_size, embedding_dim, n_filters,
                filter_sizes, output_dim, pad_idx):
    n_emb = 2 if model_type == "multichannel" else 1
    keys = list(jax.random.split(key, n_emb + 2 * len(filter_sizes) + 2))

    params = {}

    embs = []
    for _ in range(n_emb):
        e = jax.random.normal(keys.pop(0), (vocab_size, embedding_dim),
                              dtype=jnp.float32)
        e = e.at[pad_idx].set(0.0)              # padding_idx row is zero
        embs.append(e)
    params["embeddings"] = embs

    convs = []
    for fs in filter_sizes:
        bound = 1.0 / math.sqrt(embedding_dim * fs)
        # stored as (fs, D, F): tap-major so the kernel's im2col matches.
        w = jax.random.uniform(keys.pop(0), (fs, embedding_dim, n_filters),
                               minval=-bound, maxval=bound, dtype=jnp.float32)
        b = jax.random.uniform(keys.pop(0), (1, n_filters),
                               minval=-bound, maxval=bound, dtype=jnp.float32)
        convs.append((w, b))
    params["convs"] = convs

    k_in = len(filter_sizes) * n_filters
    bound = 1.0 / math.sqrt(k_in)
    params["fc_w"] = jax.random.uniform(keys.pop(0), (k_in, output_dim),
                                        minval=-bound, maxval=bound,
                                        dtype=jnp.float32)
    params["fc_b"] = jax.random.uniform(keys.pop(0), (1, output_dim),
                                        minval=-bound, maxval=bound,
                                        dtype=jnp.float32)
    return params


# ----------------------------------------------------------------------------
if __name__ == "__main__":
    MODEL_TYPE = "multichannel"
    VOCAB_SIZE = 50
    EMBED_DIM = 32
    N_FILTERS = 8
    FILTER_SIZES = (3, 4, 5)
    OUTPUT_DIM = 4
    PAD_IDX = 0
    BATCH = 2
    SEQ_LEN = 16

    root = jax.random.PRNGKey(0)
    k_param, k_text = jax.random.split(root)

    params = init_params(
        k_param,
        model_type=MODEL_TYPE,
        vocab_size=VOCAB_SIZE,
        embedding_dim=EMBED_DIM,
        n_filters=N_FILTERS,
        filter_sizes=FILTER_SIZES,
        output_dim=OUTPUT_DIM,
        pad_idx=PAD_IDX,
    )

    text = jax.random.randint(k_text, (BATCH, SEQ_LEN), 0, VOCAB_SIZE,
                              dtype=jnp.int32)

    out = cnn1d_forward(params, text, filter_sizes=FILTER_SIZES)
    out = jax.block_until_ready(out)

    assert out.shape == (BATCH, OUTPUT_DIM), out.shape
    assert out.dtype == jnp.float32
    print("KERNEL_OK")
</pallas_src>

<mosaic_0001>
module attributes {stable_mosaic.version = 11 : i64} {
  func.func @_fused_cnn_kernel(%arg0: memref<2x32x128xf32, #tpu.memory_space<vmem>>, %arg1: memref<384x128xbf16, #tpu.memory_space<vmem>>, %arg2: memref<512x128xbf16, #tpu.memory_space<vmem>>, %arg3: memref<640x128xbf16, #tpu.memory_space<vmem>>, %arg4: memref<1x128xf32, #tpu.memory_space<vmem>>, %arg5: memref<1x128xf32, #tpu.memory_space<vmem>>, %arg6: memref<1x128xf32, #tpu.memory_space<vmem>>, %arg7: memref<384x128xf32, #tpu.memory_space<vmem>>, %arg8: memref<1x128xf32, #tpu.memory_space<vmem>>, %arg9: memref<2x128xf32, #tpu.memory_space<vmem>>) attributes {dimension_semantics = [], scalar_prefetch = 0 : i64, scratch_operands = 0 : i64, tpu.core_type = #tpu.core_type<tc>} {
    %c0 = arith.constant 0 : index
    %c0_0 = arith.constant 0 : index
    %c0_1 = arith.constant 0 : index
    %0 = vector.load %arg0[%c0, %c0_0, %c0_1] : memref<2x32x128xf32, #tpu.memory_space<vmem>>, vector<1x32x128xf32>
    %1 = vector.shape_cast %0 : vector<1x32x128xf32> to vector<32x128xf32>
    %c1 = arith.constant 1 : index
    %c0_2 = arith.constant 0 : index
    %c0_3 = arith.constant 0 : index
    %2 = vector.load %arg0[%c1, %c0_2, %c0_3] : memref<2x32x128xf32, #tpu.memory_space<vmem>>, vector<1x32x128xf32>
    %3 = vector.shape_cast %2 : vector<1x32x128xf32> to vector<32x128xf32>
    %cst = arith.constant 0.000000e+00 : f32
    %4 = vector.broadcast %cst : f32 to vector<2x128xf32>
    %cst_4 = arith.constant 0.000000e+00 : f32
    %5 = vector.broadcast %cst_4 : f32 to vector<30x128xf32>
    %6 = vector.extract_strided_slice %1 {offsets = [0, 0], sizes = [30, 128], strides = [1, 1]} : vector<32x128xf32> to vector<30x128xf32>
    %7 = vector.extract_strided_slice %1 {offsets = [1, 0], sizes = [30, 128], strides = [1, 1]} : vector<32x128xf32> to vector<30x128xf32>
    %8 = vector.extract_strided_slice %1 {offsets = [2, 0], sizes = [30, 128], strides = [1, 1]} : vector<32x128xf32> to vector<30x128xf32>
    %9 = tpu.concatenate %6, %7, %8 in 1 : vector<30x128xf32>, vector<30x128xf32>, vector<30x128xf32> -> vector<30x384xf32>
    %10 = arith.truncf %9 : vector<30x384xf32> to vector<30x384xbf16>
    %c0_5 = arith.constant 0 : index
    %c0_6 = arith.constant 0 : index
    %11 = vector.load %arg1[%c0_5, %c0_6] : memref<384x128xbf16, #tpu.memory_space<vmem>>, vector<384x128xbf16>
    %cst_7 = arith.constant dense<0.000000e+00> : vector<30x128xf32>
    %12 = tpu.matmul %10, %11, %cst_7 {dimension_numbers = #tpu.dot_dimension_numbers<[1], [0], [0], [1], [0, 0, 1, 1], [], []>} : vector<30x384xbf16>, vector<384x128xbf16>, vector<30x128xf32> -> vector<30x128xf32>
    %c0_8 = arith.constant 0 : index
    %c0_9 = arith.constant 0 : index
    %13 = vector.load %arg4[%c0_8, %c0_9] : memref<1x128xf32, #tpu.memory_space<vmem>>, vector<1x128xf32>
    %14 = vector.broadcast %13 : vector<1x128xf32> to vector<30x128xf32>
    %15 = arith.addf %12, %14 : vector<30x128xf32>
    %cst_10 = arith.constant 0.000000e+00 : f32
    %16 = vector.broadcast %cst_10 : f32 to vector<30x128xf32>
    %17 = arith.maximumf %15, %16 : vector<30x128xf32>
    %18 = arith.addf %5, %17 : vector<30x128xf32>
    %19 = vector.extract_strided_slice %3 {offsets = [0, 0], sizes = [30, 128], strides = [1, 1]} : vector<32x128xf32> to vector<30x128xf32>
    %20 = vector.extract_strided_slice %3 {offsets = [1, 0], sizes = [30, 128], strides = [1, 1]} : vector<32x128xf32> to vector<30x128xf32>
    %21 = vector.extract_strided_slice %3 {offsets = [2, 0], sizes = [30, 128], strides = [1, 1]} : vector<32x128xf32> to vector<30x128xf32>
    %22 = tpu.concatenate %19, %20, %21 in 1 : vector<30x128xf32>, vector<30x128xf32>, vector<30x128xf32> -> vector<30x384xf32>
    %23 = arith.truncf %22 : vector<30x384xf32> to vector<30x384xbf16>
    %c0_11 = arith.constant 0 : index
    %c0_12 = arith.constant 0 : index
    %24 = vector.load %arg1[%c0_11, %c0_12] : memref<384x128xbf16, #tpu.memory_space<vmem>>, vector<384x128xbf16>
    %cst_13 = arith.constant dense<0.000000e+00> : vector<30x128xf32>
    %25 = tpu.matmul %23, %24, %cst_13 {dimension_numbers = #tpu.dot_dimension_numbers<[1], [0], [0], [1], [0, 0, 1, 1], [], []>} : vector<30x384xbf16>, vector<384x128xbf16>, vector<30x128xf32> -> vector<30x128xf32>
    %c0_14 = arith.constant 0 : index
    %c0_15 = arith.constant 0 : index
    %26 = vector.load %arg4[%c0_14, %c0_15] : memref<1x128xf32, #tpu.memory_space<vmem>>, vector<1x128xf32>
    %27 = vector.broadcast %26 : vector<1x128xf32> to vector<30x128xf32>
    %28 = arith.addf %25, %27 : vector<30x128xf32>
    %cst_16 = arith.constant 0.000000e+00 : f32
    %29 = vector.broadcast %cst_16 : f32 to vector<30x128xf32>
    %30 = arith.maximumf %28, %29 : vector<30x128xf32>
    %31 = arith.addf %18, %30 : vector<30x128xf32>
    %32 = vector.extract_strided_slice %31 {offsets = [0, 0], sizes = [14, 128], strides = [1, 1]} : vector<30x128xf32> to vector<14x128xf32>
    %cst_17 = arith.constant dense<0xFF800000> : vector<128xf32>
    %33 = vector.multi_reduction <maximumf>, %32, %cst_17 [0] : vector<14x128xf32> to vector<128xf32>
    %34 = vector.shape_cast %33 : vector<128xf32> to vector<1x128xf32>
    %35 = vector.extract_strided_slice %31 {offsets = [16, 0], sizes = [14, 128], strides = [1, 1]} : vector<30x128xf32> to vector<14x128xf32>
    %cst_18 = arith.constant dense<0xFF800000> : vector<128xf32>
    %36 = vector.multi_reduction <maximumf>, %35, %cst_18 [0] : vector<14x128xf32> to vector<128xf32>
    %37 = vector.shape_cast %36 : vector<128xf32> to vector<1x128xf32>
    %38 = tpu.concatenate %34, %37 in 0 : vector<1x128xf32>, vector<1x128xf32> -> vector<2x128xf32>
    %c0_19 = arith.constant 0 : index
    %c0_20 = arith.constant 0 : index
    %39 = vector.load %arg7[%c0_19, %c0_20] : memref<384x128xf32, #tpu.memory_space<vmem>>, vector<128x128xf32>
    %cst_21 = arith.constant dense<0.000000e+00> : vector<2x128xf32>
    %40 = tpu.matmul %38, %39, %cst_21 {dimension_numbers = #tpu.dot_dimension_numbers<[1], [0], [0], [1], [0, 0, 1, 1], [], []>} : vector<2x128xf32>, vector<128x128xf32>, vector<2x128xf32> -> vector<2x128xf32>
    %41 = arith.addf %4, %40 : vector<2x128xf32>
    %cst_22 = arith.constant 0.000000e+00 : f32
    %42 = vector.broadcast %cst_22 : f32 to vector<29x128xf32>
    %43 = vector.extract_strided_slice %1 {offsets = [0, 0], sizes = [29, 128], strides = [1, 1]} : vector<32x128xf32> to vector<29x128xf32>
    %44 = vector.extract_strided_slice %1 {offsets = [1, 0], sizes = [29, 128], strides = [1, 1]} : vector<32x128xf32> to vector<29x128xf32>
    %45 = vector.extract_strided_slice %1 {offsets = [2, 0], sizes = [29, 128], strides = [1, 1]} : vector<32x128xf32> to vector<29x128xf32>
    %46 = vector.extract_strided_slice %1 {offsets = [3, 0], sizes = [29, 128], strides = [1, 1]} : vector<32x128xf32> to vector<29x128xf32>
    %47 = tpu.concatenate %43, %44, %45, %46 in 1 : vector<29x128xf32>, vector<29x128xf32>, vector<29x128xf32>, vector<29x128xf32> -> vector<29x512xf32>
    %48 = arith.truncf %47 : vector<29x512xf32> to vector<29x512xbf16>
    %c0_23 = arith.constant 0 : index
    %c0_24 = arith.constant 0 : index
    %49 = vector.load %arg2[%c0_23, %c0_24] : memref<512x128xbf16, #tpu.memory_space<vmem>>, vector<512x128xbf16>
    %cst_25 = arith.constant dense<0.000000e+00> : vector<29x128xf32>
    %50 = tpu.matmul %48, %49, %cst_25 {dimension_numbers = #tpu.dot_dimension_numbers<[1], [0], [0], [1], [0, 0, 1, 1], [], []>} : vector<29x512xbf16>, vector<512x128xbf16>, vector<29x128xf32> -> vector<29x128xf32>
    %c0_26 = arith.constant 0 : index
    %c0_27 = arith.constant 0 : index
    %51 = vector.load %arg5[%c0_26, %c0_27] : memref<1x128xf32, #tpu.memory_space<vmem>>, vector<1x128xf32>
    %52 = vector.broadcast %51 : vector<1x128xf32> to vector<29x128xf32>
    %53 = arith.addf %50, %52 : vector<29x128xf32>
    %cst_28 = arith.constant 0.000000e+00 : f32
    %54 = vector.broadcast %cst_28 : f32 to vector<29x128xf32>
    %55 = arith.maximumf %53, %54 : vector<29x128xf32>
    %56 = arith.addf %42, %55 : vector<29x128xf32>
    %57 = vector.extract_strided_slice %3 {offsets = [0, 0], sizes = [29, 128], strides = [1, 1]} : vector<32x128xf32> to vector<29x128xf32>
    %58 = vector.extract_strided_slice %3 {offsets = [1, 0], sizes = [29, 128], strides = [1, 1]} : vector<32x128xf32> to vector<29x128xf32>
    %59 = vector.extract_strided_slice %3 {offsets = [2, 0], sizes = [29, 128], strides = [1, 1]} : vector<32x128xf32> to vector<29x128xf32>
    %60 = vector.extract_strided_slice %3 {offsets = [3, 0], sizes = [29, 128], strides = [1, 1]} : vector<32x128xf32> to vector<29x128xf32>
    %61 = tpu.concatenate %57, %58, %59, %60 in 1 : vector<29x128xf32>, vector<29x128xf32>, vector<29x128xf32>, vector<29x128xf32> -> vector<29x512xf32>
    %62 = arith.truncf %61 : vector<29x512xf32> to vector<29x512xbf16>
    %c0_29 = arith.constant 0 : index
    %c0_30 = arith.constant 0 : index
    %63 = vector.load %arg2[%c0_29, %c0_30] : memref<512x128xbf16, #tpu.memory_space<vmem>>, vector<512x128xbf16>
    %cst_31 = arith.constant dense<0.000000e+00> : vector<29x128xf32>
    %64 = tpu.matmul %62, %63, %cst_31 {dimension_numbers = #tpu.dot_dimension_numbers<[1], [0], [0], [1], [0, 0, 1, 1], [], []>} : vector<29x512xbf16>, vector<512x128xbf16>, vector<29x128xf32> -> vector<29x128xf32>
    %c0_32 = arith.constant 0 : index
    %c0_33 = arith.constant 0 : index
    %65 = vector.load %arg5[%c0_32, %c0_33] : memref<1x128xf32, #tpu.memory_space<vmem>>, vector<1x128xf32>
    %66 = vector.broadcast %65 : vector<1x128xf32> to vector<29x128xf32>
    %67 = arith.addf %64, %66 : vector<29x128xf32>
    %cst_34 = arith.constant 0.000000e+00 : f32
    %68 = vector.broadcast %cst_34 : f32 to vector<29x128xf32>
    %69 = arith.maximumf %67, %68 : vector<29x128xf32>
    %70 = arith.addf %56, %69 : vector<29x128xf32>
    %71 = vector.extract_strided_slice %70 {offsets = [0, 0], sizes = [13, 128], strides = [1, 1]} : vector<29x128xf32> to vector<13x128xf32>
    %cst_35 = arith.constant dense<0xFF800000> : vector<128xf32>
    %72 = vector.multi_reduction <maximumf>, %71, %cst_35 [0] : vector<13x128xf32> to vector<128xf32>
    %73 = vector.shape_cast %72 : vector<128xf32> to vector<1x128xf32>
    %74 = vector.extract_strided_slice %70 {offsets = [16, 0], sizes = [13, 128], strides = [1, 1]} : vector<29x128xf32> to vector<13x128xf32>
    %cst_36 = arith.constant dense<0xFF800000> : vector<128xf32>
    %75 = vector.multi_reduction <maximumf>, %74, %cst_36 [0] : vector<13x128xf32> to vector<128xf32>
    %76 = vector.shape_cast %75 : vector<128xf32> to vector<1x128xf32>
    %77 = tpu.concatenate %73, %76 in 0 : vector<1x128xf32>, vector<1x128xf32> -> vector<2x128xf32>
    %c128 = arith.constant 128 : index
    %c0_37 = arith.constant 0 : index
    %78 = vector.load %arg7[%c128, %c0_37] : memref<384x128xf32, #tpu.memory_space<vmem>>, vector<128x128xf32>
    %cst_38 = arith.constant dense<0.000000e+00> : vector<2x128xf32>
    %79 = tpu.matmul %77, %78, %cst_38 {dimension_numbers = #tpu.dot_dimension_numbers<[1], [0], [0], [1], [0, 0, 1, 1], [], []>} : vector<2x128xf32>, vector<128x128xf32>, vector<2x128xf32> -> vector<2x128xf32>
    %80 = arith.addf %41, %79 : vector<2x128xf32>
    %cst_39 = arith.constant 0.000000e+00 : f32
    %81 = vector.broadcast %cst_39 : f32 to vector<28x128xf32>
    %82 = vector.extract_strided_slice %1 {offsets = [0, 0], sizes = [28, 128], strides = [1, 1]} : vector<32x128xf32> to vector<28x128xf32>
    %83 = vector.extract_strided_slice %1 {offsets = [1, 0], sizes = [28, 128], strides = [1, 1]} : vector<32x128xf32> to vector<28x128xf32>
    %84 = vector.extract_strided_slice %1 {offsets = [2, 0], sizes = [28, 128], strides = [1, 1]} : vector<32x128xf32> to vector<28x128xf32>
    %85 = vector.extract_strided_slice %1 {offsets = [3, 0], sizes = [28, 128], strides = [1, 1]} : vector<32x128xf32> to vector<28x128xf32>
    %86 = vector.extract_strided_slice %1 {offsets = [4, 0], sizes = [28, 128], strides = [1, 1]} : vector<32x128xf32> to vector<28x128xf32>
    %87 = tpu.concatenate %82, %83, %84, %85, %86 in 1 : vector<28x128xf32>, vector<28x128xf32>, vector<28x128xf32>, vector<28x128xf32>, vector<28x128xf32> -> vector<28x640xf32>
    %88 = arith.truncf %87 : vector<28x640xf32> to vector<28x640xbf16>
    %c0_40 = arith.constant 0 : index
    %c0_41 = arith.constant 0 : index
    %89 = vector.load %arg3[%c0_40, %c0_41] : memref<640x128xbf16, #tpu.memory_space<vmem>>, vector<640x128xbf16>
    %cst_42 = arith.constant dense<0.000000e+00> : vector<28x128xf32>
    %90 = tpu.matmul %88, %89, %cst_42 {dimension_numbers = #tpu.dot_dimension_numbers<[1], [0], [0], [1], [0, 0, 1, 1], [], []>} : vector<28x640xbf16>, vector<640x128xbf16>, vector<28x128xf32> -> vector<28x128xf32>
    %c0_43 = arith.constant 0 : index
    %c0_44 = arith.constant 0 : index
    %91 = vector.load %arg6[%c0_43, %c0_44] : memref<1x128xf32, #tpu.memory_space<vmem>>, vector<1x128xf32>
    %92 = vector.broadcast %91 : vector<1x128xf32> to vector<28x128xf32>
    %93 = arith.addf %90, %92 : vector<28x128xf32>
    %cst_45 = arith.constant 0.000000e+00 : f32
    %94 = vector.broadcast %cst_45 : f32 to vector<28x128xf32>
    %95 = arith.maximumf %93, %94 : vector<28x128xf32>
    %96 = arith.addf %81, %95 : vector<28x128xf32>
    %97 = vector.extract_strided_slice %3 {offsets = [0, 0], sizes = [28, 128], strides = [1, 1]} : vector<32x128xf32> to vector<28x128xf32>
    %98 = vector.extract_strided_slice %3 {offsets = [1, 0], sizes = [28, 128], strides = [1, 1]} : vector<32x128xf32> to vector<28x128xf32>
    %99 = vector.extract_strided_slice %3 {offsets = [2, 0], sizes = [28, 128], strides = [1, 1]} : vector<32x128xf32> to vector<28x128xf32>
    %100 = vector.extract_strided_slice %3 {offsets = [3, 0], sizes = [28, 128], strides = [1, 1]} : vector<32x128xf32> to vector<28x128xf32>
    %101 = vector.extract_strided_slice %3 {offsets = [4, 0], sizes = [28, 128], strides = [1, 1]} : vector<32x128xf32> to vector<28x128xf32>
    %102 = tpu.concatenate %97, %98, %99, %100, %101 in 1 : vector<28x128xf32>, vector<28x128xf32>, vector<28x128xf32>, vector<28x128xf32>, vector<28x128xf32> -> vector<28x640xf32>
    %103 = arith.truncf %102 : vector<28x640xf32> to vector<28x640xbf16>
    %c0_46 = arith.constant 0 : index
    %c0_47 = arith.constant 0 : index
    %104 = vector.load %arg3[%c0_46, %c0_47] : memref<640x128xbf16, #tpu.memory_space<vmem>>, vector<640x128xbf16>
    %cst_48 = arith.constant dense<0.000000e+00> : vector<28x128xf32>
    %105 = tpu.matmul %103, %104, %cst_48 {dimension_numbers = #tpu.dot_dimension_numbers<[1], [0], [0], [1], [0, 0, 1, 1], [], []>} : vector<28x640xbf16>, vector<640x128xbf16>, vector<28x128xf32> -> vector<28x128xf32>
    %c0_49 = arith.constant 0 : index
    %c0_50 = arith.constant 0 : index
    %106 = vector.load %arg6[%c0_49, %c0_50] : memref<1x128xf32, #tpu.memory_space<vmem>>, vector<1x128xf32>
    %107 = vector.broadcast %106 : vector<1x128xf32> to vector<28x128xf32>
    %108 = arith.addf %105, %107 : vector<28x128xf32>
    %cst_51 = arith.constant 0.000000e+00 : f32
    %109 = vector.broadcast %cst_51 : f32 to vector<28x128xf32>
    %110 = arith.maximumf %108, %109 : vector<28x128xf32>
    %111 = arith.addf %96, %110 : vector<28x128xf32>
    %112 = vector.extract_strided_slice %111 {offsets = [0, 0], sizes = [12, 128], strides = [1, 1]} : vector<28x128xf32> to vector<12x128xf32>
    %cst_52 = arith.constant dense<0xFF800000> : vector<128xf32>
    %113 = vector.multi_reduction <maximumf>, %112, %cst_52 [0] : vector<12x128xf32> to vector<128xf32>
    %114 = vector.shape_cast %113 : vector<128xf32> to vector<1x128xf32>
    %115 = vector.extract_strided_slice %111 {offsets = [16, 0], sizes = [12, 128], strides = [1, 1]} : vector<28x128xf32> to vector<12x128xf32>
    %cst_53 = arith.constant dense<0xFF800000> : vector<128xf32>
    %116 = vector.multi_reduction <maximumf>, %115, %cst_53 [0] : vector<12x128xf32> to vector<128xf32>
    %117 = vector.shape_cast %116 : vector<128xf32> to vector<1x128xf32>
    %118 = tpu.concatenate %114, %117 in 0 : vector<1x128xf32>, vector<1x128xf32> -> vector<2x128xf32>
    %c256 = arith.constant 256 : index
    %c0_54 = arith.constant 0 : index
    %119 = vector.load %arg7[%c256, %c0_54] : memref<384x128xf32, #tpu.memory_space<vmem>>, vector<128x128xf32>
    %cst_55 = arith.constant dense<0.000000e+00> : vector<2x128xf32>
    %120 = tpu.matmul %118, %119, %cst_55 {dimension_numbers = #tpu.dot_dimension_numbers<[1], [0], [0], [1], [0, 0, 1, 1], [], []>} : vector<2x128xf32>, vector<128x128xf32>, vector<2x128xf32> -> vector<2x128xf32>
    %121 = arith.addf %80, %120 : vector<2x128xf32>
    %c0_56 = arith.constant 0 : index
    %c0_57 = arith.constant 0 : index
    %122 = vector.load %arg8[%c0_56, %c0_57] : memref<1x128xf32, #tpu.memory_space<vmem>>, vector<1x128xf32>
    %123 = vector.broadcast %122 : vector<1x128xf32> to vector<2x128xf32>
    %124 = arith.addf %121, %123 : vector<2x128xf32>
    %c0_58 = arith.constant 0 : index
    %c0_59 = arith.constant 0 : index
    %125 = vector.load %arg9[%c0_58, %c0_59] : memref<2x128xf32, #tpu.memory_space<vmem>>, vector<2x128xf32>
    tpu.vector_store %arg9[%c0_58, %c0_59], %124 {strides = array<i32>} : memref<2x128xf32, #tpu.memory_space<vmem>>, vector<2x128xf32>,
    return
  }
}

</mosaic_0001>

<bundles_post_ra>
// kernel: tpu_custom_call.1
= control target key start
LH: loop header
LB: loop body
LE: loop exit
PB: predicated region body
PF: predicated region fallthrough
CT: control target
= control target key end

     0   :  { %14 = vsyncpa [#allocation3], 0  ;;  %s3025_s0 = inlined_call_operand.hbm [shape: f32[2,32,128], index: 0, kind: input, shape index: {}]   ;;  %s3026_s1 = inlined_call_operand.hbm [shape: bf16[384,128], index: 1, kind: input, shape index: {}]   ;;  %s3027_s2 = inlined_call_operand.hbm [shape: bf16[512,128], index: 2, kind: input, shape index: {}]   ;;  %s3028_s3 = inlined_call_operand.hbm [shape: bf16[640,128], index: 3, kind: input, shape index: {}]   ;;  %s3029_s4 = inlined_call_operand.vmem [shape: f32[1,128], index: 4, kind: input, shape index: {}]   ;;  %s3030_s5 = inlined_call_operand.vmem [shape: f32[1,128], index: 5, kind: input, shape index: {}]   ;;  %s3031_s6 = inlined_call_operand.vmem [shape: f32[1,128], index: 6, kind: input, shape index: {}]   ;;  %s3032_s7 = inlined_call_operand.hbm [shape: f32[384,128], index: 7, kind: input, shape index: {}]   ;;  %s3033_s8 = inlined_call_operand.vmem [shape: f32[1,128], index: 8, kind: input, shape index: {}]   ;;  %s3034_s9 = inlined_call_operand.hbm [shape: f32[2,128], index: 9, kind: output, shape index: {}]  }
   0x1   :  { %15 = vsyncpa [#allocation6], 0 }
   0x2   :  { %16 = vsyncpa [#allocation9], 0  ;;  %s35_s11 = sshll.u32 %s3026_s1, 4  ;;  %s36_s11 = int_to_ptr.hbm [resolvable:$true] %s35_s11 }
   0x3   :  { %17 = vsyncpa [#allocation4], 0  ;;  %s2372_s12 = smov [#allocation5]   ;;  %s61_s16 = sshll.u32 %s3028_s3, 4  ;;  %s62_s16 = int_to_ptr.hbm [resolvable:$true] %s61_s16 }
   0x4   :  { %s37_s13 = sshll.u32 %s2372_s12, 4  ;;  %s2373_s17 = smov 64   ;;  %s38_s13 = int_to_ptr.vmem [resolvable:$true] %s37_s13 }
   0x5   :  { %s2374_s18 = smov 4   ;;  %s2375_s19 = smov [#allocation8]  }
   0x6   :  { %43 = dma.hbm_to_vmem [thread:$0]  %s36_s11, 3072, %s38_s13, [#allocation6], %s2373_s17, %s2373_s17, %s2374_s18  }
   0x7   :  { %s63_s20 = sshll.u32 %s2375_s19, 4  ;;  %s22_s23 = sshll.u32 %s3025_s0, 4  ;;  %s64_s20 = int_to_ptr.vmem [resolvable:$true] %s63_s20  ;;  %s23_s23 = int_to_ptr.hbm [resolvable:$true] %s22_s23 }
   0x8   :  { %69 = dma.hbm_to_vmem [thread:$0]  %s62_s16, 5120, %s64_s20, [#allocation9], %s2373_s17, %s2373_s17, %s2374_s18  }
   0x9   :  { %s2376_s1 = smov [#allocation2]   ;;  %s48_s3 = sshll.u32 %s3027_s2, 4  ;;  %s49_s3 = int_to_ptr.hbm [resolvable:$true] %s48_s3 }
   0xa   :  { %s24_s24 = sshll.u32 %s2376_s1, 4  ;;  %s2377_s27 = smov 128   ;;  %s25_s24 = int_to_ptr.vmem [resolvable:$true] %s24_s24 }
   0xb   :  { %s2378_s28 = smov 8   ;;  %s2379_s29 = smov [#allocation7]  }
   0xc   :  { %30 = dma.hbm_to_vmem [thread:$0]  %s23_s23, 1024, %s25_s24, [#allocation3], %s2377_s27, %s2377_s27, %s2378_s28  }
   0xd   :  { %s50_s30 = sshll.u32 %s2379_s29, 4  ;;  %s80_s0 = sshll.u32 %s3032_s7, 4  ;;  %s51_s30 = int_to_ptr.vmem [resolvable:$true] %s50_s30  ;;  %s81_s0 = int_to_ptr.hbm [resolvable:$true] %s80_s0 }
   0xe   :  { %56 = dma.hbm_to_vmem [thread:$0]  %s49_s3, 4096, %s51_s30, [#allocation6], %s2373_s17, %s2373_s17, %s2374_s18  }
   0xf   :  { %s2380_s12 = smov [#allocation10]  }
  0x10   :  { %s82_s13 = sshll.u32 %s2380_s12, 4  ;;  %s83_s13 = int_to_ptr.vmem [resolvable:$true] %s82_s13 }
  0x11   :  { %88 = dma.hbm_to_vmem [thread:$0]  %s81_s0, 6144, %s83_s13, [#allocation9], %s2377_s27, %s2377_s27, %s2378_s28  }
  0x12   :  { %2364 = dma.done.wait [#allocation3], 1024  }
  0x13   :  { %2365 = vsyncadd [#allocation3], 4294966272 }
  0x14   :  { %2366 = dma.done.wait [#allocation6], 7168  }
  0x15   :  { %2367 = vsyncadd [#allocation6], 4294960128 }
  0x16   :  { %2368 = dma.done.wait [#allocation9], 11264  }
  0x17   :  { %2369 = vsyncadd [#allocation9], 4294956032  ;;  %v2101_v0 = vld [vmem:[#allocation5 + $0x38] sm:$0xff]  ;;  %v2100_v3 = vld [vmem:[#allocation5 + $0x30] sm:$0xff]  ;;  %vm124_vm0 = vcmask 1046528   ;;  %vm136_vm1 = vcmask 1045504  }
  0x18   :  { %v2447_v1 = vld [vmem:[#allocation5 + $0x78] sm:$0xff]  ;;  %350 = vmatpush.bf16.msra.mxu0 %v2101_v0  ;;  %v2452_v4 = vld [vmem:[#allocation5 + $0x70] sm:$0xff]  ;;  %447 = vmatpush.bf16.msra.mxu3 %v2101_v0  ;;  %v2099_v6 = vld [vmem:[#allocation5 + $0x28] sm:$0xff]  ;;  %vm546_vm2 = vcmask 1044480   ;;  %vm528_vm3 = vcmask 1040384   ;;  %vm1074_vm4 = vcmask 1043456  }
  0x19   :  { %v2449_v2 = vld [vmem:[#allocation5 + $0xb8] sm:$0xff]  ;;  %369 = vmatpush.bf16.msra.mxu1 %v2447_v1  ;;  %v2455_v5 = vld [vmem:[#allocation5 + $0xb0] sm:$0xff]  ;;  %v2458_v7 = vld [vmem:[#allocation5 + $0x68] sm:$0xff]  ;;  %s2381_s17 = smov [#allocation11]   ;;  %s1698_s21 = sshll.u32 %s3034_s9, 4  ;;  %s1699_s21 = int_to_ptr.hbm [resolvable:$true] %s1698_s21 }
  0x1a   :  { %388 = vmatpush.bf16.msra.mxu2 %v2449_v2  ;;  %v2461_v8 = vld [vmem:[#allocation5 + $0xa8] sm:$0xff]  ;;  %v2098_v9 = vld [vmem:[#allocation5 + $0x20] sm:$0xff]  ;;  %v2097_v12 = vld [vmem:[#allocation5 + $0x18] sm:$0xff]  ;;  %s1696_s18 = sshll.u32 %s2381_s17, 4  ;;  %s1697_s18 = int_to_ptr.vmem [resolvable:$true] %s1696_s18 }
  0x1b   :  { %v2464_v10 = vld [vmem:[#allocation5 + $0x60] sm:$0xff]  ;;  %v2470_v13 = vld [vmem:[#allocation5 + $0x58] sm:$0xff]  ;;  %v2096_v15 = vld [vmem:[#allocation5 + $0x10] sm:$0xff] }
  0x1c   :  { %351 = vmatpush.bf16.msra.mxu0 %v2100_v3  ;;  %448 = vmatpush.bf16.msra.mxu3 %v2100_v3  ;;  %v2467_v11 = vld [vmem:[#allocation5 + $0xa0] sm:$0xff]  ;;  %v2473_v14 = vld [vmem:[#allocation5 + $0x98] sm:$0xff]  ;;  %v2476_v16 = vld [vmem:[#allocation5 + $0x50] sm:$0xff] }
  0x1d   :  { %370 = vmatpush.bf16.msra.mxu1 %v2452_v4  ;;  %v2478_v17 = vld [vmem:[#allocation5 + $0x90] sm:$0xff]  ;;  %v2481_v18 = vld [vmem:[#allocation2] sm:$0xff]  ;;  %v2483_v19 = vld [vmem:[#allocation2 + $0x8] sm:$0xff] }
  0x1e   :  { %389 = vmatpush.bf16.msra.mxu2 %v2455_v5  ;;  %v2485_v20 = vld [vmem:[#allocation2 + $0x10] sm:$0xff]  ;;  %v2095_v21 = vld [vmem:[#allocation5 + $0x8] sm:$0xff]  ;;  %v125_v23 = vrot.slane %v2481_v18, 1  ;;  %v126_v24 = vrot.slane %v2483_v19, 1  ;;  %v137_v27 = vrot.slane %v2481_v18, 2  ;;  %v138_v28 = vrot.slane %v2483_v19, 2 }
  0x1f   :  { %v2488_v22 = vld [vmem:[#allocation5 + $0x48] sm:$0xff]  ;;  %v128_v25 = vrot.slane %v2485_v20, 1  ;;  %v140_v29 = vrot.slane %v2485_v20, 2  ;;  %v2094_v30 = vld [vmem:[#allocation5] sm:$0xff]  ;;  %v2511_v37 = vpack.c.bf16 %v2483_v19, %v2481_v18  ;;  %v2522_v42 = vld [vmem:[#allocation7 + $0x78] sm:$0xff] }
  0x20   :  { %352 = vmatpush.bf16.msra.mxu0 %v2099_v6  ;;  %449 = vmatpush.bf16.msra.mxu3 %v2099_v6  ;;  %v2494_v26 = vld [vmem:[#allocation5 + $0x88] sm:$0xff]  ;;  %v2500_v31 = vld [vmem:[#allocation5 + $0x40] sm:$0xff]  ;;  %v127_v32 = vsel %vm124_vm0, %v125_v23, %v126_v24  ;;  %v139_v35 = vsel %vm136_vm1, %v137_v27, %v138_v28  ;;  %v2526_v43 = vld [vmem:[#allocation7 + $0x38] sm:$0xff] }
  0x21   :  { %371 = vmatpush.bf16.msra.mxu1 %v2458_v7  ;;  %v129_v33 = vsel %vm124_vm0, %v126_v24, %v128_v25  ;;  %v2505_v34 = vld [vmem:[#allocation5 + $0x80] sm:$0xff]  ;;  %v141_v36 = vsel %vm136_vm1, %v138_v28, %v140_v29  ;;  %v2517_v40 = vld [vmem:[#allocation2 + $0x28] sm:$0xff]  ;;  %v2537_v45 = vld [vmem:[#allocation7 + $0x70] sm:$0xff] }
  0x22   :  { %390 = vmatpush.bf16.msra.mxu2 %v2461_v8  ;;  %v2513_v38 = vpack.c.bf16 %v129_v33, %v127_v32  ;;  %v2515_v39 = vld [vmem:[#allocation2 + $0x20] sm:$0xff]  ;;  %v2520_v41 = vpack.c.bf16 %v141_v36, %v139_v35  ;;  %v2541_v46 = vld [vmem:[#allocation2 + $0x18] sm:$0xff]  ;;  %v2543_v47 = vld [vmem:[#allocation7 + $0x30] sm:$0xff]  ;;  %v420_v3 = vrot.slane %v2517_v40, 1  ;;  %v431_v6 = vrot.slane %v2517_v40, 2 }
  0x23   :  { %v2531_v44 = vpack.c.bf16 %v2517_v40, %v2515_v39  ;;  %v130_v48 = vrot.slane %v2541_v46, 1  ;;  %v2549_v49 = vld [vmem:[#allocation7 + $0x68] sm:$0xff]  ;;  %v142_v50 = vrot.slane %v2541_v46, 2  ;;  %v2559_v53 = vld [vmem:[#allocation7 + $0x60] sm:$0xff]  ;;  %v2569_v56 = vpack.c.bf16 %v2541_v46, %v2485_v20  ;;  %v2573_v58 = vld [vmem:[#allocation2 + $0x38] sm:$0xff] }
  0x24   :  { %353 = vmatpush.bf16.msra.mxu0 %v2098_v9  ;;  %450 = vmatpush.bf16.msra.mxu3 %v2098_v9  ;;  %v2554_v51 = vld [vmem:[#allocation7 + $0x28] sm:$0xff]  ;;  %v2564_v55 = vld [vmem:[#allocation7 + $0x20] sm:$0xff]  ;;  %v2578_v60 = vld [vmem:[#allocation7 + $0x58] sm:$0xff] }
  0x25   :  { %372 = vmatpush.bf16.msra.mxu1 %v2464_v10  ;;  %v131_v52 = vsel %vm124_vm0, %v128_v25, %v130_v48  ;;  %v143_v54 = vsel %vm136_vm1, %v140_v29, %v142_v50  ;;  %v2582_v61 = vld [vmem:[#allocation7 + $0x18] sm:$0xff]  ;;  %v2584_v62 = vld [vmem:[#allocation2 + $0x30] sm:$0xff]  ;;  %v2614_v9 = vld [vmem:[#allocation7 + $0x8] sm:$0xff]  ;;  %v424_v29 = vrot.slane %v2573_v58, 1 }
  0x26   :  { %391 = vmatpush.bf16.msra.mxu2 %v2467_v11  ;;  %v2571_v57 = vpack.c.bf16 %v130_v48, %v131_v52  ;;  %v2575_v59 = vpack.c.bf16 %v142_v50, %v143_v54  ;;  %v2589_v63 = vpack.c.bf16 %v2573_v58, %v2584_v62  ;;  %v2595_v0 = vld [vmem:[#allocation7 + $0x50] sm:$0xff]  ;;  %v2647_v25 = vld [vmem:[#allocation7 + $0xa8] sm:$0xff]  ;;  %v2138_v27 = vld [vmem:[#allocation7 + $0xa0] sm:$0xff]  ;;  %v547_v50 = vrot.slane %v2481_v18, 3 }
  0x27   :  { %v2641_v24 = vld [vmem:[#allocation7 + $0xf0] sm:$0xff]  ;;  %v2146_v28 = vld [vmem:[#allocation7 + $0xe0] sm:$0xff]  ;;  %v550_v52 = vrot.slane %v2485_v20, 3 }
  0x28   :  { %354 = vmatpush.bf16.msra.mxu0 %v2097_v12  ;;  %451 = vmatpush.bf16.msra.mxu3 %v2097_v12  ;;  %3042 = vst [vmem:[#allocation16_spill] sm:$0xff] %v2575_v59  ;;  %v2136_v35 = vld [vmem:[#allocation7 + $0x90] sm:$0xff]  ;;  %v2134_v48 = vld [vmem:[#allocation7 + $0x80] sm:$0xff] }
  0x29   :  { %373 = vmatpush.bf16.msra.mxu1 %v2470_v13 }
  0x2a   :  { %392 = vmatpush.bf16.msra.mxu2 %v2473_v14 }
  0x2c   :  { %355 = vmatpush.bf16.msra.mxu0 %v2096_v15  ;;  %452 = vmatpush.bf16.msra.mxu3 %v2096_v15 }
  0x2d   :  { %374 = vmatpush.bf16.msra.mxu1 %v2476_v16 }
  0x2e   :  { %393 = vmatpush.bf16.msra.mxu2 %v2478_v17 }
  0x30   :  { %356 = vmatpush.bf16.msra.mxu0 %v2095_v21  ;;  %453 = vmatpush.bf16.msra.mxu3 %v2095_v21  ;;  %v2634_v21 = vld [vmem:[#allocation7 + $0xb0] sm:$0xff] }
  0x31   :  { %375 = vmatpush.bf16.msra.mxu1 %v2488_v22 }
  0x32   :  { %394 = vmatpush.bf16.msra.mxu2 %v2494_v26 }
  0x34   :  { %357 = vmatpush.bf16.msra.mxu0 %v2094_v30  ;;  %454 = vmatpush.bf16.msra.mxu3 %v2094_v30  ;;  %v435_v30 = vrot.slane %v2573_v58, 2 }
  0x35   :  { %376 = vmatpush.bf16.msra.mxu1 %v2500_v31 }
  0x36   :  { %395 = vmatpush.bf16.msra.mxu2 %v2505_v34 }
  0x37   :  { %358 = vmatmul.bf16.vlgmr.msra.gmra.mxu0 %v2511_v37  ;;  %455 = vmatmul.bf16.vlgmr.msra.gmra.mxu3 %v2531_v44 }
  0x38   :  { %466 = vmatpush.bf16.msrb.mxu0 %v2447_v1  ;;  %377 = vmatmul.bf16.vlgmr.msra.gmra.mxu1 %v2513_v38  ;;  %v2599_v1 = vld [vmem:[#allocation7 + $0x10] sm:$0xff] }
  0x39   :  { %485 = vmatpush.bf16.msrb.mxu1 %v2449_v2  ;;  %396 = vmatmul.bf16.vlgmr.msra.gmra.mxu2 %v2520_v41  ;;  %v419_v2 = vrot.slane %v2515_v39, 1 }
  0x3a   :  { %839 = vmatpush.bf16.msrb.mxu3 %v2522_v42  ;;  %820 = vmatpush.bf16.msrb.mxu2 %v2526_v43 }
  0x3b   :  { %v421_v12 = vsel %vm124_vm0, %v419_v2, %v420_v3 }
  0x3c   :  { %467 = vmatpush.bf16.msrb.mxu0 %v2452_v4  ;;  %v422_v4 = vrot.slane %v2584_v62, 1 }
  0x3d   :  { %486 = vmatpush.bf16.msrb.mxu1 %v2455_v5  ;;  %v430_v5 = vrot.slane %v2515_v39, 2 }
  0x3e   :  { %840 = vmatpush.bf16.msrb.mxu3 %v2537_v45  ;;  %821 = vmatpush.bf16.msrb.mxu2 %v2543_v47  ;;  %v425_v32 = vsel %vm124_vm0, %v422_v4, %v424_v29 }
  0x3f   :  { %v2668_v36 = vpack.c.bf16 %v424_v29, %v425_v32 }
  0x40   :  { %468 = vmatpush.bf16.msrb.mxu0 %v2458_v7  ;;  %v433_v7 = vrot.slane %v2584_v62, 2 }
  0x41   :  { %487 = vmatpush.bf16.msrb.mxu1 %v2461_v8  ;;  %v2610_v8 = vld [vmem:[#allocation7 + $0x48] sm:$0xff]  ;;  %3044 = vst [vmem:[#allocation18_spill] sm:$0xff] %v2668_v36 }
  0x42   :  { %841 = vmatpush.bf16.msrb.mxu3 %v2549_v49  ;;  %822 = vmatpush.bf16.msrb.mxu2 %v2554_v51  ;;  %v434_v15 = vsel %vm136_vm1, %v431_v6, %v433_v7  ;;  %v436_v33 = vsel %vm136_vm1, %v433_v7, %v435_v30 }
  0x44   :  { %469 = vmatpush.bf16.msrb.mxu0 %v2464_v10  ;;  %v2617_v10 = vld [vmem:[#allocation7 + $0xb8] sm:$0xff] }
  0x45   :  { %488 = vmatpush.bf16.msrb.mxu1 %v2467_v11  ;;  %v2619_v11 = vld [vmem:[#allocation7 + $0xf8] sm:$0xff] }
  0x46   :  { %842 = vmatpush.bf16.msrb.mxu3 %v2559_v53  ;;  %823 = vmatpush.bf16.msrb.mxu2 %v2564_v55 }
  0x47   :  { %363 = vmatmul.bf16.gmra.mxu0 %v2569_v56  ;;  %460 = vmatmul.bf16.gmra.mxu3 %v2589_v63 }
  0x48   :  { %470 = vmatpush.bf16.msrb.mxu0 %v2470_v13  ;;  %382 = vmatmul.bf16.gmra.mxu1 %v2571_v57  ;;  %v423_v13 = vsel %vm124_vm0, %v420_v3, %v422_v4  ;;  %v909_v3 = vrot.slane %v2573_v58, 3 }
  0x49   :  { %489 = vmatpush.bf16.msrb.mxu1 %v2473_v14  ;;  %401 = vmatmul.bf16.gmra.mxu2 %v2575_v59  ;;  %v432_v14 = vsel %vm136_vm1, %v430_v5, %v431_v6 }
  0x4a   :  { %843 = vmatpush.bf16.msrb.mxu3 %v2578_v60  ;;  %824 = vmatpush.bf16.msrb.mxu2 %v2582_v61  ;;  %v2638_v23 = vpack.c.bf16 %v434_v15, %v432_v14  ;;  %v543_v14 = vld [vmem:[#allocation10 + $0x68] sm:$0xff] }
  0x4c   :  { %471 = vmatpush.bf16.msrb.mxu0 %v2476_v16  ;;  %v2626_v16 = vld [vmem:[#allocation7 + $0x40] sm:$0xff] }
  0x4d   :  { %490 = vmatpush.bf16.msrb.mxu1 %v2478_v17  ;;  %v2630_v17 = vld [vmem:[#allocation7] sm:$0xff] }
  0x4e   :  { %844 = vmatpush.bf16.msrb.mxu3 %v2595_v0  ;;  %825 = vmatpush.bf16.msrb.mxu2 %v2599_v1 }
  0x50   :  { %472 = vmatpush.bf16.msrb.mxu0 %v2488_v22  ;;  %v2636_v22 = vpack.c.bf16 %v423_v13, %v421_v12  ;;  %v545_v12 = vld [vmem:[#allocation10 + $0x78] sm:$0xff]  ;;  %v544_v13 = vld [vmem:[#allocation10 + $0x70] sm:$0xff] }
  0x51   :  { %491 = vmatpush.bf16.msrb.mxu1 %v2494_v26  ;;  %v2653_v26 = vld [vmem:[#allocation7 + $0xe8] sm:$0xff] }
  0x52   :  { %845 = vmatpush.bf16.msrb.mxu3 %v2610_v8  ;;  %826 = vmatpush.bf16.msrb.mxu2 %v2614_v9  ;;  %3043 = vst [vmem:[#allocation17_spill] sm:$0xff] %v2636_v22 }
  0x54   :  { %473 = vmatpush.bf16.msrb.mxu0 %v2500_v31  ;;  %v2137_v31 = vld [vmem:[#allocation7 + $0x98] sm:$0xff] }
  0x55   :  { %492 = vmatpush.bf16.msrb.mxu1 %v2505_v34  ;;  %v2145_v34 = vld [vmem:[#allocation7 + $0xd8] sm:$0xff] }
  0x56   :  { %846 = vmatpush.bf16.msrb.mxu3 %v2626_v16  ;;  %827 = vmatpush.bf16.msrb.mxu2 %v2630_v17 }
  0x57   :  { %474 = vmatmul.bf16.vlgmr.msrb.gmra.mxu0 %v2636_v22 }
  0x58   :  { %858 = vmatpush.bf16.msra.mxu0 %v2617_v10  ;;  %493 = vmatmul.bf16.vlgmr.msrb.gmra.mxu1 %v2638_v23 }
  0x59   :  { %877 = vmatpush.bf16.msra.mxu1 %v2619_v11  ;;  %828 = vmatmul.bf16.vlgmr.msrb.gmra.mxu2 %v2511_v37 }
  0x5a   :  { %936 = vmatpush.bf16.msra.mxu3 %v2522_v42  ;;  %917 = vmatpush.bf16.msra.mxu2 %v2526_v43  ;;  %v2670_v42 = vpack.c.bf16 %v435_v30, %v436_v33  ;;  %v2144_v43 = vld [vmem:[#allocation7 + $0xd0] sm:$0xff]  ;;  %v538_v30 = vld [vmem:[#allocation10 + $0x40] sm:$0xff]  ;;  %v537_v33 = vld [vmem:[#allocation10 + $0x38] sm:$0xff] }
  0x5b   :  { %847 = vmatmul.bf16.vlgmr.msrb.gmra.mxu3 %v2513_v38 }
  0x5c   :  { %859 = vmatpush.bf16.msra.mxu0 %v2634_v21 }
  0x5d   :  { %878 = vmatpush.bf16.msra.mxu1 %v2641_v24 }
  0x5e   :  { %937 = vmatpush.bf16.msra.mxu3 %v2537_v45  ;;  %918 = vmatpush.bf16.msra.mxu2 %v2543_v47  ;;  %v2135_v45 = vld [vmem:[#allocation7 + $0x88] sm:$0xff] }
  0x5f   :  { %v2143_v47 = vld [vmem:[#allocation7 + $0xc8] sm:$0xff] }
  0x60   :  { %860 = vmatpush.bf16.msra.mxu0 %v2647_v25 }
  0x61   :  { %879 = vmatpush.bf16.msra.mxu1 %v2653_v26 }
  0x62   :  { %938 = vmatpush.bf16.msra.mxu3 %v2549_v49  ;;  %919 = vmatpush.bf16.msra.mxu2 %v2554_v51  ;;  %v2142_v49 = vld [vmem:[#allocation7 + $0xc0] sm:$0xff]  ;;  %v548_v51 = vrot.slane %v2483_v19, 3  ;;  %v552_v19 = vrot.slane %v2541_v46, 3  ;;  %v904_v46 = vrot.slane %v2515_v39, 3 }
  0x64   :  { %861 = vmatpush.bf16.msra.mxu0 %v2138_v27  ;;  %v551_v54 = vsel %vm546_vm2, %v548_v51, %v550_v52  ;;  %v553_v20 = vsel %vm546_vm2, %v550_v52, %v552_v19 }
  0x65   :  { %880 = vmatpush.bf16.msra.mxu1 %v2146_v28 }
  0x66   :  { %939 = vmatpush.bf16.msra.mxu3 %v2559_v53  ;;  %920 = vmatpush.bf16.msra.mxu2 %v2564_v55  ;;  %v549_v53 = vsel %vm546_vm2, %v547_v50, %v548_v51  ;;  %v2704_v55 = vpack.c.bf16 %v552_v19, %v553_v20 }
  0x67   :  { %479 = vmatmul.bf16.gmra.mxu0 %v2668_v36  ;;  %v2691_v18 = vpack.c.bf16 %v551_v54, %v549_v53  ;;  %v534_v54 = vld [vmem:[#allocation10 + $0x20] sm:$0xff] }
  0x68   :  { %862 = vmatpush.bf16.msra.mxu0 %v2137_v31  ;;  %498 = vmatmul.bf16.gmra.mxu1 %v2670_v42 }
  0x69   :  { %881 = vmatpush.bf16.msra.mxu1 %v2145_v34  ;;  %833 = vmatmul.bf16.gmra.mxu2 %v2569_v56 }
  0x6a   :  { %940 = vmatpush.bf16.msra.mxu3 %v2578_v60  ;;  %921 = vmatpush.bf16.msra.mxu2 %v2582_v61  ;;  %v905_v60 = vrot.slane %v2517_v40, 3  ;;  %v907_v61 = vrot.slane %v2584_v62, 3 }
  0x6b   :  { %852 = vmatmul.bf16.gmra.mxu3 %v2571_v57 }
  0x6c   :  { %863 = vmatpush.bf16.msra.mxu0 %v2136_v35  ;;  %v910_v4 = vsel %vm546_vm2, %v907_v61, %v909_v3 }
  0x6d   :  { %882 = vmatpush.bf16.msra.mxu1 %v2144_v43  ;;  %v2721_v39 = vpack.c.bf16 %v909_v3, %v910_v4  ;;  %v532_v3 = vld [vmem:[#allocation10 + $0x10] sm:$0xff] }
  0x6e   :  { %941 = vmatpush.bf16.msra.mxu3 %v2595_v0  ;;  %922 = vmatpush.bf16.msra.mxu2 %v2599_v1  ;;  %v906_v0 = vsel %vm546_vm2, %v904_v46, %v905_v60  ;;  %v908_v1 = vsel %vm546_vm2, %v905_v60, %v907_v61  ;;  %v533_v60 = vld [vmem:[#allocation10 + $0x18] sm:$0xff] }
  0x6f   :  { %v2715_v2 = vpack.c.bf16 %v908_v1, %v906_v0  ;;  %3045 = vst [vmem:[#allocation19_spill] sm:$0xff] %v2721_v39 }
  0x70   :  { %864 = vmatpush.bf16.msra.mxu0 %v2135_v45 }
  0x71   :  { %883 = vmatpush.bf16.msra.mxu1 %v2143_v47 }
  0x72   :  { %942 = vmatpush.bf16.msra.mxu3 %v2610_v8  ;;  %923 = vmatpush.bf16.msra.mxu2 %v2614_v9 }
  0x74   :  { %865 = vmatpush.bf16.msra.mxu0 %v2134_v48 }
  0x75   :  { %884 = vmatpush.bf16.msra.mxu1 %v2142_v49 }
  0x76   :  { %943 = vmatpush.bf16.msra.mxu3 %v2626_v16  ;;  %924 = vmatpush.bf16.msra.mxu2 %v2630_v17 }
  0x77   :  { %866 = vmatmul.bf16.vlgmr.msra.gmra.mxu0 %v2520_v41 }
  0x78   :  { %955 = vmatpush.bf16.msrb.mxu0 %v2617_v10  ;;  %885 = vmatmul.bf16.vlgmr.msra.gmra.mxu1 %v2691_v18 }
  0x79   :  { %974 = vmatpush.bf16.msrb.mxu1 %v2619_v11  ;;  %925 = vmatmul.bf16.vlgmr.msra.gmra.mxu2 %v2531_v44 }
  0x7a   :  { %1054 = vmatpush.msrb.mxu3 %v545_v12 }
  0x7b   :  { %944 = vmatmul.bf16.vlgmr.msra.gmra.mxu3 %v2636_v22 }
  0x7c   :  { %956 = vmatpush.bf16.msrb.mxu0 %v2634_v21  ;;  %1055 = vmatpush.msrb.mxu3 %v544_v13  ;;  %v542_v21 = vld [vmem:[#allocation10 + $0x60] sm:$0xff] }
  0x7d   :  { %975 = vmatpush.bf16.msrb.mxu1 %v2641_v24 }
  0x7e   :  { %1056 = vmatpush.msrb.mxu3 %v543_v14 }
  0x80   :  { %957 = vmatpush.bf16.msrb.mxu0 %v2647_v25  ;;  %1057 = vmatpush.msrb.mxu3 %v542_v21  ;;  %v541_v25 = vld [vmem:[#allocation10 + $0x58] sm:$0xff]  ;;  %v530_v21 = vld [vmem:[#allocation10] sm:$0xff] }
  0x81   :  { %976 = vmatpush.bf16.msrb.mxu1 %v2653_v26  ;;  %v540_v26 = vld [vmem:[#allocation10 + $0x50] sm:$0xff] }
  0x82   :  { %1058 = vmatpush.msrb.mxu3 %v541_v25 }
  0x84   :  { %958 = vmatpush.bf16.msrb.mxu0 %v2138_v27  ;;  %1059 = vmatpush.msrb.mxu3 %v540_v26  ;;  %v539_v27 = vld [vmem:[#allocation10 + $0x48] sm:$0xff] }
  0x85   :  { %977 = vmatpush.bf16.msrb.mxu1 %v2146_v28 }
  0x86   :  { %1060 = vmatpush.msrb.mxu3 %v539_v27 }
  0x87   :  { %871 = vmatmul.bf16.gmra.mxu0 %v2575_v59 }
  0x88   :  { %959 = vmatpush.bf16.msrb.mxu0 %v2137_v31  ;;  %890 = vmatmul.bf16.gmra.mxu1 %v2704_v55  ;;  %v2208_v31 = vld [vmem:[%s3029_s4] ss:$0 sm:$0xff] }
  0x89   :  { %978 = vmatpush.bf16.msrb.mxu1 %v2145_v34  ;;  %930 = vmatmul.bf16.gmra.mxu2 %v2589_v63 }
  0x8a   :  { %1061 = vmatpush.msrb.mxu3 %v538_v30 }
  0x8b   :  { %949 = vmatmul.bf16.gmra.mxu3 %v2668_v36 }
  0x8c   :  { %960 = vmatpush.bf16.msrb.mxu0 %v2136_v35  ;;  %1062 = vmatpush.msrb.mxu3 %v537_v33 }
  0x8d   :  { %979 = vmatpush.bf16.msrb.mxu1 %v2144_v43 }
  0x90   :  { %961 = vmatpush.bf16.msrb.mxu0 %v2135_v45  ;;  %v536_v45 = vld [vmem:[#allocation10 + $0x30] sm:$0xff] }
  0x91   :  { %980 = vmatpush.bf16.msrb.mxu1 %v2143_v47  ;;  %1063 = vmatpush.msrb.mxu3 %v536_v45  ;;  %v535_v47 = vld [vmem:[#allocation10 + $0x28] sm:$0xff] }
  0x93   :  { %1064 = vmatpush.msrb.mxu3 %v535_v47 }
  0x94   :  { %962 = vmatpush.bf16.msrb.mxu0 %v2134_v48 }
  0x95   :  { %981 = vmatpush.bf16.msrb.mxu1 %v2142_v49  ;;  %1065 = vmatpush.msrb.mxu3 %v534_v54 }
  0x97   :  { %963 = vmatmul.bf16.vlgmr.msrb.gmra.mxu0 %v2638_v23  ;;  %1066 = vmatpush.msrb.mxu3 %v533_v60 }
  0x98   :  { %982 = vmatmul.bf16.vlgmr.msrb.gmra.mxu1 %v2715_v2 }
  0x99   :  { %1067 = vmatpush.msrb.mxu3 %v532_v3 }
  0xa7   :  { %968 = vmatmul.bf16.gmra.mxu0 %v2670_v42 }
  0xa8   :  { %987 = vmatmul.bf16.gmra.mxu1 %v2721_v39 }
  0xb4   :  { %v359_v40 = vpop.f32.mrf.mxu0 }
  0xb5   :  { %v378_v62 = vpop.f32.mrf.mxu1  ;;  %v360_v50 = vadd.f32 %v2208_v31, %v359_v40  ;;  %v531_v40 = vld [vmem:[#allocation10 + $0x8] sm:$0xff] }
  0xb6   :  { %1068 = vmatpush.msrb.mxu3 %v531_v40  ;;  %v1030_v40 = vld [vmem:[#allocation10 + $0xe0] sm:$0xff] }
  0xb7   :  { %v379_v0 = vadd.f32 %v378_v62, %v360_v50 }
  0xb8   :  { %1069 = vmatpush.msrb.mxu3 %v530_v21  ;;  %v1028_v21 = vld [vmem:[#allocation10 + $0xd0] sm:$0xff] }
  0xba   :  { %v456_v8 = vpop.f32.mrf.mxu3 }
  0xbb   :  { %v457_v43 = vadd.f32 %v2208_v31, %v456_v8 }
  0xbc   :  { %v2725_v5 = vpop.f32.mrf.mxu2  ;;  %v361_v6 = vpop.f32.mrf.mxu0 }
  0xbd   :  { %v380_v7 = vpop.f32.mrf.mxu1  ;;  %v362_v34 = vadd.f32 %v2208_v31, %v361_v6  ;;  %v398_v8 = vadd.f32 %v2725_v5, %v379_v0 }
  0xbf   :  { %v381_v48 = vadd.f32 %v380_v7, %v362_v34  ;;  %v407_v25 = vmax.f32 %v398_v8, 0.0  ;;  %v2770_v8 = vld [vmem:[#allocation8 + $0x70] sm:$0xff] }
  0xc2   :  { %v458_v58 = vpop.f32.mrf.mxu3 }
  0xc3   :  { %v459_v49 = vadd.f32 %v2208_v31, %v458_v58 }
  0xc4   :  { %v399_v9 = vpop.f32.mrf.mxu2  ;;  %v2727_v10 = vpop.f32.mrf.mxu0 }
  0xc5   :  { %v2729_v11 = vpop.f32.mrf.mxu1  ;;  %v400_v19 = vadd.f32 %v399_v9, %v381_v48 }
  0xc7   :  { %v408_v4 = vmax.f32 %v400_v19, 0.0  ;;  %v2757_v19 = vld [vmem:[#allocation8 + $0x78] sm:$0xff] }
  0xc8   :  { %1431 = vmatpush.bf16.msra.mxu1 %v2757_v19 }
  0xca   :  { %v461_v24 = vpop.f32.mrf.mxu3 }
  0xcb   :  { %v462_v12 = vadd.f32 %v2208_v31, %v461_v24 }
  0xcc   :  { %v2731_v15 = vpop.f32.mrf.mxu2  ;;  %v366_v16 = vpop.f32.mrf.mxu0  ;;  %1432 = vmatpush.bf16.msra.mxu1 %v2770_v8 }
  0xcd   :  { %v2733_v17 = vpop.f32.mrf.mxu1  ;;  %v367_v62 = vadd.f32 %v2208_v31, %v366_v16 }
  0xcf   :  { %v386_v5 = vadd.f32 %v2733_v17, %v367_v62  ;;  %v2778_v62 = vld [vmem:[#allocation8 + $0xf8] sm:$0xff] }
  0xd0   :  { %1469 = vmatpush.bf16.msra.mxu3 %v2778_v62 }
  0xd2   :  { %v463_v35 = vpop.f32.mrf.mxu3 }
  0xd3   :  { %v464_v34 = vadd.f32 %v2208_v31, %v463_v35 }
  0xd4   :  { %v475_v28 = vpop.f32.mrf.mxu0  ;;  %v404_v32 = vpop.f32.mrf.mxu2 }
  0xd5   :  { %v494_v29 = vpop.f32.mrf.mxu1  ;;  %v476_v51 = vadd.f32 %v475_v28, %v457_v43  ;;  %v365_v28 = vadd.f32 %v2208_v31, %v2727_v10  ;;  %v405_v16 = vadd.f32 %v404_v32, %v386_v5  ;;  %v1033_v10 = vld [vmem:[#allocation10 + $0xf8] sm:$0xff]  ;;  %v1031_v32 = vld [vmem:[#allocation10 + $0xe8] sm:$0xff] }
  0xd6   :  { %1034 = vmatpush.msrb.mxu2 %v1033_v10 }
  0xd7   :  { %v495_v1 = vadd.f32 %v494_v29, %v476_v51  ;;  %v384_v24 = vadd.f32 %v2729_v11, %v365_v28  ;;  %v410_v17 = vmax.f32 %v405_v16, 0.0  ;;  %v1032_v11 = vld [vmem:[#allocation10 + $0xf0] sm:$0xff] }
  0xd8   :  { %1035 = vmatpush.msrb.mxu2 %v1032_v11 }
  0xd9   :  { %v504_v9 = vmax.f32 %v495_v1, 0.0  ;;  %v403_v50 = vadd.f32 %v2731_v15, %v384_v24 }
  0xda   :  { %1036 = vmatpush.msrb.mxu2 %v1031_v32 }
  0xdb   :  { %v508_v29 = vadd.f32 %v504_v9, %v407_v25  ;;  %v2776_v25 = vld [vmem:[#allocation8 + $0x68] sm:$0xff] }
  0xdc   :  { %v477_v52 = vpop.f32.mrf.mxu0  ;;  %v2738_v46 = vpop.f32.mrf.mxu2  ;;  %1037 = vmatpush.msrb.mxu2 %v1030_v40  ;;  %1433 = vmatpush.bf16.msra.mxu1 %v2776_v25 }
  0xdd   :  { %v496_v53 = vpop.f32.mrf.mxu1  ;;  %v478_v20 = vadd.f32 %v477_v52, %v459_v49 }
  0xde   :  { %v2740_v7 = vpop.f32.mrf.mxu3 }
  0xdf   :  { %v497_v61 = vadd.f32 %v496_v53, %v478_v20  ;;  %v2752_v53 = vld [vmem:[#allocation8 + $0x38] sm:$0xff]  ;;  %v409_v20 = vmax.f32 %v403_v50, 0.0 }
  0xe0   :  { %1412 = vmatpush.bf16.msra.mxu0 %v2752_v53 }
  0xe1   :  { %v505_v6 = vmax.f32 %v497_v61, 0.0  ;;  %v2760_v61 = vld [vmem:[#allocation8 + $0x30] sm:$0xff] }
  0xe3   :  { %v509_v58 = vadd.f32 %v505_v6, %v408_v4 }
  0xe4   :  { %v480_v13 = vpop.f32.mrf.mxu0  ;;  %v2744_v27 = vpop.f32.mrf.mxu2  ;;  %1413 = vmatpush.bf16.msra.mxu0 %v2760_v61 }
  0xe5   :  { %v499_v14 = vpop.f32.mrf.mxu1  ;;  %v512_v26 = vsel %vm136_vm1, %v509_v58, -inf  ;;  %v481_v30 = vadd.f32 %v480_v13, %v462_v12  ;;  %v1029_v12 = vld [vmem:[#allocation10 + $0xd8] sm:$0xff]  ;;  %v2773_v13 = vld [vmem:[#allocation8 + $0x28] sm:$0xff] }
  0xe6   :  { %v513_v33 = vmax.f32 %v508_v29, %v512_v26  ;;  %v2748_v43 = vpop.f32.mrf.mxu3  ;;  %1038 = vmatpush.msrb.mxu2 %v1029_v12  ;;  %v2818_v12 = vld [vmem:[#allocation8 + $0xe0] sm:$0xff] }
  0xe7   :  { %v500_v45 = vadd.f32 %v499_v14, %v481_v30  ;;  %v1027_v30 = vld [vmem:[#allocation10 + $0xc8] sm:$0xff] }
  0xe8   :  { %v514_v51 = vrot.slane %v513_v33, 4  ;;  %1414 = vmatpush.bf16.msra.mxu0 %v2773_v13  ;;  %1039 = vmatpush.msrb.mxu2 %v1028_v21  ;;  %v2822_v21 = vld [vmem:[#allocation8 + $0x8] sm:$0xff] }
  0xe9   :  { %v506_v54 = vmax.f32 %v500_v45, 0.0  ;;  %v1026_v45 = vld [vmem:[#allocation10 + $0xc0] sm:$0xff] }
  0xea   :  { %v515_v60 = vmax.f32 %v513_v33, %v514_v51  ;;  %v2784_v33 = vld [vmem:[#allocation8 + $0x20] sm:$0xff]  ;;  %1040 = vmatpush.msrb.mxu2 %v1027_v30  ;;  %v1025_v51 = vld [vmem:[#allocation10 + $0xb8] sm:$0xff]  ;;  %v2825_v30 = vld [vmem:[#allocation8 + $0x48] sm:$0xff] }
  0xeb   :  { %v510_v0 = vadd.f32 %v506_v54, %v409_v20  ;;  %v1024_v54 = vld [vmem:[#allocation10 + $0xb0] sm:$0xff]  ;;  %v1023_v20 = vld [vmem:[#allocation10 + $0xa8] sm:$0xff]  ;;  %3047 = vst [vmem:[#allocation21_spill] sm:$0xff] %v2825_v30 }
  0xec   :  { %v482_v47 = vpop.f32.mrf.mxu0  ;;  %v2754_v35 = vpop.f32.mrf.mxu2  ;;  %v516_v58 = vrot.slane %v515_v60, 2  ;;  %1415 = vmatpush.bf16.msra.mxu0 %v2784_v33  ;;  %1041 = vmatpush.msrb.mxu2 %v1026_v45  ;;  %v1019_v45 = vld [vmem:[#allocation10 + $0x88] sm:$0xff] }
  0xed   :  { %v501_v48 = vpop.f32.mrf.mxu1  ;;  %v483_v49 = vadd.f32 %v482_v47, %v464_v34  ;;  %v2791_v47 = vld [vmem:[#allocation8 + $0x60] sm:$0xff] }
  0xee   :  { %v2767_v6 = vpop.f32.mrf.mxu3  ;;  %v517_v28 = vmax.f32 %v515_v60, %v516_v58  ;;  %1434 = vmatpush.bf16.msra.mxu1 %v2791_v47  ;;  %1042 = vmatpush.msrb.mxu2 %v1025_v51  ;;  %v2808_v60 = vld [vmem:[#allocation8 + $0x10] sm:$0xff]  ;;  %v1022_v58 = vld [vmem:[#allocation10 + $0xa0] sm:$0xff] }
  0xef   :  { %v502_v52 = vadd.f32 %v501_v48, %v483_v49  ;;  %v2793_v48 = vld [vmem:[#allocation8 + $0xf0] sm:$0xff] }
  0xf0   :  { %v518_v16 = vrot.slane %v517_v28, 1  ;;  %1470 = vmatpush.bf16.msra.mxu3 %v2793_v48  ;;  %1043 = vmatpush.msrb.mxu2 %v1024_v54  ;;  %v2838_v54 = vld [vmem:[#allocation8 + $0x40] sm:$0xff] }
  0xf1   :  { %v507_v31 = vmax.f32 %v502_v52, 0.0  ;;  %v2799_v52 = vld [vmem:[#allocation8 + $0x18] sm:$0xff]  ;;  %3048 = vst [vmem:[#allocation22_spill] sm:$0xff] %v2838_v54 }
  0xf2   :  { %1416 = vmatpush.bf16.msra.mxu0 %v2799_v52  ;;  %v519_v11 = vmax.f32 %v517_v28, %v518_v16  ;;  %1044 = vmatpush.msrb.mxu2 %v1023_v20  ;;  %v1020_v28 = vld [vmem:[#allocation10 + $0x90] sm:$0xff]  ;;  %v2831_v16 = vld [vmem:[#allocation8] sm:$0xff] }
  0xf3   :  { %v511_v15 = vadd.f32 %v507_v31, %v410_v17  ;;  %v2802_v17 = vld [vmem:[#allocation8 + $0x58] sm:$0xff]  ;;  %v2804_v31 = vld [vmem:[#allocation8 + $0xe8] sm:$0xff]  ;;  %v2845_v20 = vld [vmem:[%s3030_s5] ss:$0 sm:$0xff] }
  0xf4   :  { %v2762_v1 = vpop.f32.mrf.mxu0  ;;  %v2780_v29 = vpop.f32.mrf.mxu2  ;;  %1435 = vmatpush.bf16.msra.mxu1 %v2802_v17  ;;  %1471 = vmatpush.bf16.msra.mxu3 %v2804_v31 }
  0xf5   :  { %v2764_v3 = vpop.f32.mrf.mxu1  ;;  %v520_v4 = vsel %vm136_vm1, %v511_v15, -inf  ;;  %1045 = vmatpush.msrb.mxu2 %v1022_v58  ;;  %v2172_v58 = vld [vmem:[#allocation8 + $0xb0] sm:$0xff] }
  0xf6   :  { %v521_v9 = vmax.f32 %v510_v0, %v520_v4  ;;  %v2795_v50 = vpop.f32.mrf.mxu3  ;;  %1417 = vmatpush.bf16.msra.mxu0 %v2808_v60 }
  0xf8   :  { %v522_v14 = vrot.slane %v521_v9, 4  ;;  %1472 = vmatpush.bf16.msra.mxu3 %v2818_v12 }
  0xfa   :  { %v523_v26 = vmax.f32 %v521_v9, %v522_v14  ;;  %v2816_v9 = vld [vmem:[#allocation8 + $0x50] sm:$0xff]  ;;  %v1021_v14 = vld [vmem:[#allocation10 + $0x98] sm:$0xff]  ;;  %1418 = vmatpush.bf16.msra.mxu0 %v2822_v21 }
  0xfb   :  { %3046 = vst [vmem:[#allocation20_spill] sm:$0xff] %v2816_v9  ;;  %1436 = vmatpush.bf16.msra.mxu1 %v2816_v9  ;;  %1046 = vmatpush.msrb.mxu2 %v1021_v14  ;;  %v2850_v14 = vld [vmem:[#allocation8 + $0xc8] sm:$0xff]  ;;  %v2170_v9 = vld [vmem:[#allocation8 + $0xa0] sm:$0xff] }
  0xfc   :  { %v524_v5 = vrot.slane %v523_v26, 2  ;;  %v2786_v34 = vpop.f32.mrf.mxu0  ;;  %v926_v40 = vpop.f32.mrf.mxu2 }
  0xfd   :  { %v2788_v24 = vpop.f32.mrf.mxu1  ;;  %1047 = vmatpush.msrb.mxu2 %v1020_v28  ;;  %v832_v28 = vadd.f32 %v2845_v20, %v2744_v27 }
  0xfe   :  { %v525_v49 = vmax.f32 %v523_v26, %v524_v5  ;;  %v945_v26 = vpop.f32.mrf.mxu3  ;;  %v2827_v5 = vld [vmem:[#allocation8 + $0xd8] sm:$0xff]  ;;  %1419 = vmatpush.bf16.msra.mxu0 %v2831_v16 }
  0xff   :  { %1437 = vmatpush.bf16.msra.mxu1 %v2825_v30  ;;  %1473 = vmatpush.bf16.msra.mxu3 %v2827_v5  ;;  %v2865_v30 = vld [vmem:[#allocation8 + $0x138] sm:$0xff] }
 0x100   :  { %v526_v10 = vrot.slane %v525_v49, 1  ;;  %1048 = vmatpush.msrb.mxu2 %v1019_v45 }
 0x101   :  { %1420 = vmatmul.bf16.vlgmr.msra.gmra.mxu0 %v2511_v37  ;;  %v2858_v37 = vld [vmem:[#allocation8 + $0xc0] sm:$0xff] }
 0x102   :  { %v527_v32 = vmax.f32 %v525_v49, %v526_v10  ;;  %v1018_v10 = vld [vmem:[#allocation10 + $0x80] sm:$0xff]  ;;  %1488 = vmatpush.bf16.msrb.mxu0 %v2865_v30 }
 0x103   :  { %1049 = vmatpush.msrb.mxu2 %v1018_v10  ;;  %1438 = vmatpush.bf16.msra.mxu1 %v2838_v54  ;;  %v927_v10 = vadd.f32 %v2845_v20, %v926_v40  ;;  %v2171_v54 = vld [vmem:[#allocation8 + $0xa8] sm:$0xff] }
 0x104   :  { %v2810_v15 = vpop.f32.mrf.mxu0  ;;  %v529_v4 = vsel %vm528_vm3, %v519_v11, %v527_v32  ;;  %v2173_v11 = vld [vmem:[#allocation8 + $0xb8] sm:$0xff]  ;;  %v2840_v32 = vld [vmem:[#allocation8 + $0xd0] sm:$0xff] }
 0x105   :  { %v2812_v0 = vpop.f32.mrf.mxu1  ;;  %1070 = vmatmul.f32.vlgmr.msrb.gmra.mxu3 %v529_v4  ;;  %v928_v4 = vpop.f32.mrf.mxu2  ;;  %1450 = vmatpush.bf16.msra.mxu2 %v2173_v11  ;;  %v946_v40 = vadd.f32 %v945_v26, %v927_v10  ;;  %v2169_v10 = vld [vmem:[#allocation8 + $0x98] sm:$0xff] }
 0x106   :  { %1474 = vmatpush.bf16.msra.mxu3 %v2840_v32  ;;  %1439 = vmatmul.bf16.vlgmr.msra.gmra.mxu1 %v2513_v38  ;;  %v947_v45 = vpop.f32.mrf.mxu3  ;;  %v851_v38 = vadd.f32 %v2748_v43, %v832_v28  ;;  %v929_v27 = vadd.f32 %v2845_v20, %v928_v4 }
 0x107   :  { %1528 = vmatpush.bf16.msrb.mxu1 %v2752_v53  ;;  %v830_v53 = vadd.f32 %v2845_v20, %v2738_v46 }
 0x108   :  { %v870_v59 = vadd.f32 %v2786_v34, %v851_v38  ;;  %v948_v43 = vadd.f32 %v947_v45, %v929_v27  ;;  %v2168_v45 = vld [vmem:[#allocation8 + $0x90] sm:$0xff] }
 0x109   :  { %1451 = vmatpush.bf16.msra.mxu2 %v2172_v58  ;;  %v849_v46 = vadd.f32 %v2740_v7, %v830_v53 }
 0x10a   :  { %1475 = vmatpush.bf16.msra.mxu3 %v2850_v14  ;;  %v889_v34 = vadd.f32 %v2788_v24, %v870_v59  ;;  %v835_v59 = vadd.f32 %v2845_v20, %v2754_v35 }
 0x10b   :  { %1529 = vmatpush.bf16.msrb.mxu1 %v2760_v61  ;;  %v2873_v61 = vld [vmem:[#allocation8 + $0x130] sm:$0xff]  ;;  %v868_v7 = vadd.f32 %v2762_v1, %v849_v46  ;;  %v2887_v1 = vld [vmem:[#allocation8 + $0x120] sm:$0xff] }
 0x10c   :  { %v2833_v49 = vpop.f32.mrf.mxu0  ;;  %1489 = vmatpush.bf16.msrb.mxu0 %v2873_v61  ;;  %v897_v24 = vmax.f32 %v889_v34, 0.0 }
 0x10d   :  { %v2835_v51 = vpop.f32.mrf.mxu1  ;;  %1452 = vmatpush.bf16.msra.mxu2 %v2171_v54  ;;  %v931_v39 = vpop.f32.mrf.mxu2 }
 0x10e   :  { %1476 = vmatpush.bf16.msra.mxu3 %v2858_v37  ;;  %v932_v53 = vadd.f32 %v2845_v20, %v931_v39 }
 0x10f   :  { %1530 = vmatpush.bf16.msrb.mxu1 %v2773_v13  ;;  %v2878_v13 = vld [vmem:[#allocation8 + $0x128] sm:$0xff] }
 0x110   :  { %1490 = vmatpush.bf16.msrb.mxu0 %v2878_v13 }
 0x111   :  { %1477 = vmatmul.bf16.vlgmr.msra.gmra.mxu3 %v2691_v18  ;;  %1453 = vmatpush.bf16.msra.mxu2 %v2170_v9 }
 0x112   :  { %1566 = vmatpush.bf16.msrb.mxu3 %v2173_v11  ;;  %v950_v11 = vpop.f32.mrf.mxu3  ;;  %1425 = vmatmul.bf16.gmra.mxu0 %v2569_v56 }
 0x113   :  { %1531 = vmatpush.bf16.msrb.mxu1 %v2784_v33  ;;  %v887_v33 = vadd.f32 %v2764_v3, %v868_v7  ;;  %v2896_v3 = vld [vmem:[#allocation8 + $0x118] sm:$0xff] }
 0x114   :  { %v964_v36 = vpop.f32.mrf.mxu0  ;;  %1491 = vmatpush.bf16.msrb.mxu0 %v2887_v1 }
 0x115   :  { %v983_v22 = vpop.f32.mrf.mxu1  ;;  %v965_v26 = vadd.f32 %v964_v36, %v946_v40  ;;  %1454 = vmatpush.bf16.msra.mxu2 %v2169_v10  ;;  %v933_v39 = vpop.f32.mrf.mxu2 }
 0x116   :  { %1567 = vmatpush.bf16.msrb.mxu3 %v2172_v58  ;;  %1444 = vmatmul.bf16.gmra.mxu1 %v2571_v57  ;;  %v951_v58 = vadd.f32 %v950_v11, %v932_v53  ;;  %v896_v57 = vmax.f32 %v887_v33, 0.0 }
 0x117   :  { %v984_v36 = vadd.f32 %v983_v22, %v965_v26  ;;  %1532 = vmatpush.bf16.msrb.mxu1 %v2799_v52  ;;  %v837_v22 = vadd.f32 %v2845_v20, %v2780_v29  ;;  %v2167_v52 = vld [vmem:[#allocation8 + $0x88] sm:$0xff]  ;;  %v934_v26 = vadd.f32 %v2845_v20, %v933_v39 }
 0x118   :  { %1492 = vmatpush.bf16.msrb.mxu0 %v2896_v3 }
 0x119   :  { %1455 = vmatpush.bf16.msra.mxu2 %v2168_v45  ;;  %v993_v35 = vmax.f32 %v984_v36, 0.0  ;;  %v856_v29 = vadd.f32 %v2795_v50, %v837_v22 }
 0x11a   :  { %1568 = vmatpush.bf16.msrb.mxu3 %v2171_v54  ;;  %v952_v34 = vpop.f32.mrf.mxu3 }
 0x11b   :  { %1533 = vmatpush.bf16.msrb.mxu1 %v2808_v60  ;;  %v875_v7 = vadd.f32 %v2833_v49, %v856_v29  ;;  %v2905_v60 = vld [vmem:[#allocation8 + $0x110] sm:$0xff] }
 0x11c   :  { %v966_v4 = vpop.f32.mrf.mxu0  ;;  %1493 = vmatpush.bf16.msrb.mxu0 %v2905_v60 }
 0x11d   :  { %v985_v28 = vpop.f32.mrf.mxu1  ;;  %v967_v38 = vadd.f32 %v966_v4, %v948_v43  ;;  %v854_v43 = vadd.f32 %v2767_v6, %v835_v59  ;;  %1456 = vmatpush.bf16.msra.mxu2 %v2167_v52  ;;  %v2166_v4 = vld [vmem:[#allocation8 + $0x80] sm:$0xff]  ;;  %v2213_v59 = vld [vmem:[#allocation2 + $0x8] sm:$0xff] }
 0x11e   :  { %1569 = vmatpush.bf16.msrb.mxu3 %v2170_v9  ;;  %v953_v9 = vadd.f32 %v952_v34, %v934_v26 }
 0x11f   :  { %v986_v18 = vadd.f32 %v985_v28, %v967_v38  ;;  %v997_v28 = vadd.f32 %v993_v35, %v896_v57  ;;  %v873_v38 = vadd.f32 %v2810_v15, %v854_v43  ;;  %1534 = vmatpush.bf16.msrb.mxu1 %v2822_v21  ;;  %v894_v15 = vadd.f32 %v2835_v51, %v875_v7  ;;  %v2912_v21 = vld [vmem:[#allocation8 + $0x108] sm:$0xff]  ;;  %v2218_v7 = vld [vmem:[#allocation2 + $0x30] sm:$0xff] }
 0x120   :  { %1494 = vmatpush.bf16.msrb.mxu0 %v2912_v21 }
 0x121   :  { %v994_v27 = vmax.f32 %v986_v18, 0.0  ;;  %1482 = vmatmul.bf16.gmra.mxu3 %v2704_v55  ;;  %1457 = vmatpush.bf16.msra.mxu2 %v2166_v4  ;;  %v892_v18 = vadd.f32 %v2812_v0, %v873_v38  ;;  %v2212_v55 = vld [vmem:[#allocation2] sm:$0xff]  ;;  %v899_v22 = vmax.f32 %v894_v15, 0.0 }
 0x122   :  { %1570 = vmatpush.bf16.msrb.mxu3 %v2169_v10  ;;  %v1075_v10 = vrot.slane %v2212_v55, 4 }
 0x123   :  { %v998_v56 = vadd.f32 %v994_v27, %v897_v24  ;;  %1535 = vmatpush.bf16.msrb.mxu1 %v2831_v16  ;;  %v1076_v24 = vrot.slane %v2213_v59, 4  ;;  %v2214_v27 = vld [vmem:[#allocation2 + $0x10] sm:$0xff]  ;;  %v2182_v16 = vld [vmem:[#allocation8 + $0x100] sm:$0xff]  ;;  %v898_v35 = vmax.f32 %v892_v18, 0.0 }
 0x124   :  { %v969_v40 = vpop.f32.mrf.mxu0  ;;  %v1078_v51 = vrot.slane %v2214_v27, 4  ;;  %1495 = vmatpush.bf16.msrb.mxu0 %v2182_v16 }
 0x125   :  { %v988_v46 = vpop.f32.mrf.mxu1  ;;  %v1001_v54 = vsel %vm546_vm2, %v998_v56, -inf  ;;  %v970_v6 = vadd.f32 %v969_v40, %v951_v58  ;;  %v1077_v39 = vsel %vm1074_vm4, %v1075_v10, %v1076_v24 }
 0x126   :  { %v1002_v50 = vmax.f32 %v997_v28, %v1001_v54  ;;  %1571 = vmatpush.bf16.msrb.mxu3 %v2168_v45  ;;  %v1079_v45 = vsel %vm1074_vm4, %v1076_v24, %v1078_v51  ;;  %1536 = vmatmul.bf16.vlgmr.msrb.gmra.mxu1 %v2531_v44 }
 0x127   :  { %v989_v20 = vadd.f32 %v988_v46, %v970_v6  ;;  %1604 = vmatpush.bf16.msra.mxu1 %v2865_v30  ;;  %v1086_v46 = vpack.c.bf16 %v1079_v45, %v1077_v39 }
 0x128   :  { %v1003_v49 = vrot.slane %v1002_v50, 4  ;;  %1585 = vmatpush.bf16.msra.mxu0 %v2778_v62 }
 0x129   :  { %v995_v33 = vmax.f32 %v989_v20, 0.0  ;;  %1496 = vmatmul.bf16.vlgmr.msrb.gmra.mxu0 %v1086_v46 }
 0x12a   :  { %v1004_v30 = vmax.f32 %v1002_v50, %v1003_v49  ;;  %1572 = vmatpush.bf16.msrb.mxu3 %v2167_v52 }
 0x12b   :  { %1605 = vmatpush.bf16.msra.mxu1 %v2873_v61  ;;  %v999_v40 = vadd.f32 %v995_v33, %v898_v35 }
 0x12c   :  { %v971_v11 = vpop.f32.mrf.mxu0  ;;  %v1005_v57 = vrot.slane %v1004_v30, 2  ;;  %1586 = vmatpush.bf16.msra.mxu0 %v2793_v48 }
 0x12d   :  { %v972_v36 = vadd.f32 %v971_v11, %v953_v9  ;;  %v990_v53 = vpop.f32.mrf.mxu1  ;;  %v3053_v9 = vld [vmem:[#allocation22_spill] sm:$0xff] }
 0x12e   :  { %1573 = vmatpush.bf16.msrb.mxu3 %v2166_v4  ;;  %v1006_v52 = vmax.f32 %v1004_v30, %v1005_v57 }
 0x12f   :  { %v991_v0 = vadd.f32 %v990_v53, %v972_v36  ;;  %1606 = vmatpush.bf16.msra.mxu1 %v2878_v13 }
 0x130   :  { %v1007_v26 = vrot.slane %v1006_v52, 1  ;;  %1587 = vmatpush.bf16.msra.mxu0 %v2804_v31 }
 0x131   :  { %v996_v56 = vmax.f32 %v991_v0, 0.0  ;;  %1574 = vmatmul.bf16.vlgmr.msrb.gmra.mxu3 %v2638_v23 }
 0x132   :  { %2190 = vmatpush.bf16.msra.mxu3 %v2778_v62  ;;  %v2215_v62 = vld [vmem:[#allocation2 + $0x18] sm:$0xff]  ;;  %v1008_v6 = vmax.f32 %v1006_v52, %v1007_v26 }
 0x133   :  { %v1000_v58 = vadd.f32 %v996_v56, %v899_v22  ;;  %1607 = vmatpush.bf16.msra.mxu1 %v2887_v1  ;;  %v1080_v28 = vrot.slane %v2215_v62, 4 }
 0x134   :  { %1588 = vmatpush.bf16.msra.mxu0 %v2818_v12 }
 0x135   :  { %v1009_v43 = vsel %vm546_vm2, %v1000_v58, -inf  ;;  %v1081_v34 = vsel %vm1074_vm4, %v1078_v51, %v1080_v28 }
 0x136   :  { %v1010_v29 = vmax.f32 %v999_v40, %v1009_v43  ;;  %2191 = vmatpush.bf16.msra.mxu3 %v2793_v48  ;;  %1541 = vmatmul.bf16.gmra.mxu1 %v2589_v63  ;;  %v1087_v1 = vpack.c.bf16 %v1080_v28, %v1081_v34  ;;  %v2216_v63 = vld [vmem:[#allocation2 + $0x20] sm:$0xff]  ;;  %v1663_v28 = vld [vmem:[#allocation10 + $0x178] sm:$0xff]  ;;  %v1662_v34 = vld [vmem:[#allocation10 + $0x170] sm:$0xff] }
 0x137   :  { %1608 = vmatpush.bf16.msra.mxu1 %v2896_v3  ;;  %v2217_v3 = vld [vmem:[#allocation2 + $0x28] sm:$0xff] }
 0x138   :  { %v1011_v54 = vrot.slane %v1010_v29, 4  ;;  %1589 = vmatpush.bf16.msra.mxu0 %v2827_v5  ;;  %v1516_v38 = vrot.slane %v2217_v3, 4 }
 0x139   :  { %1501 = vmatmul.bf16.gmra.mxu0 %v1087_v1  ;;  %v1659_v1 = vld [vmem:[#allocation10 + $0x158] sm:$0xff] }
 0x13a   :  { %v1012_v44 = vmax.f32 %v1010_v29, %v1011_v54  ;;  %2192 = vmatpush.bf16.msra.mxu3 %v2804_v31  ;;  %v1515_v31 = vrot.slane %v2216_v63, 4 }
 0x13b   :  { %1609 = vmatpush.bf16.msra.mxu1 %v2905_v60  ;;  %v1518_v60 = vrot.slane %v2218_v7, 4  ;;  %v1658_v7 = vld [vmem:[#allocation10 + $0x150] sm:$0xff] }
 0x13c   :  { %v1013_v61 = vrot.slane %v1012_v44, 2  ;;  %1590 = vmatpush.bf16.msra.mxu0 %v2840_v32 }
 0x13e   :  { %v1014_v4 = vmax.f32 %v1012_v44, %v1013_v61  ;;  %2193 = vmatpush.bf16.msra.mxu3 %v2818_v12  ;;  %v1519_v12 = vsel %vm1074_vm4, %v1516_v38, %v1518_v60 }
 0x13f   :  { %1610 = vmatpush.bf16.msra.mxu1 %v2912_v21 }
 0x140   :  { %v1015_v13 = vrot.slane %v1014_v4, 1  ;;  %1591 = vmatpush.bf16.msra.mxu0 %v2850_v14 }
 0x141   :  { %1579 = vmatmul.bf16.gmra.mxu3 %v2670_v42  ;;  %v3050_v42 = vld [vmem:[#allocation19_spill] sm:$0xff] }
 0x142   :  { %v1016_v23 = vmax.f32 %v1014_v4, %v1015_v13  ;;  %2194 = vmatpush.bf16.msra.mxu3 %v2827_v5 }
 0x143   :  { %1611 = vmatpush.bf16.msra.mxu1 %v2182_v16 }
 0x144   :  { %v1017_v48 = vsel %vm528_vm3, %v1008_v6, %v1016_v23  ;;  %1592 = vmatpush.bf16.msra.mxu0 %v2858_v37  ;;  %v1661_v6 = vld [vmem:[#allocation10 + $0x168] sm:$0xff]  ;;  %v1660_v23 = vld [vmem:[#allocation10 + $0x160] sm:$0xff] }
 0x145   :  { %1050 = vmatmul.f32.vlgmr.msrb.gmra.mxu2 %v1017_v48 }
 0x146   :  { %1547 = vmatpush.bf16.msrb.mxu2 %v2757_v19  ;;  %2195 = vmatpush.bf16.msra.mxu3 %v2840_v32  ;;  %v1517_v19 = vsel %vm1074_vm4, %v1515_v31, %v1516_v38 }
 0x147   :  { %v1526_v5 = vpack.c.bf16 %v1519_v12, %v1517_v19  ;;  %v1657_v19 = vld [vmem:[#allocation10 + $0x148] sm:$0xff] }
 0x149   :  { %1612 = vmatmul.bf16.vlgmr.msra.gmra.mxu1 %v1526_v5  ;;  %1593 = vmatmul.bf16.vlgmr.msra.gmra.mxu0 %v2715_v2  ;;  %v2967_v2 = vld [vmem:[%s3031_s6] ss:$0 sm:$0xff] }
 0x14a   :  { %1548 = vmatpush.bf16.msrb.mxu2 %v2770_v8  ;;  %2196 = vmatpush.bf16.msra.mxu3 %v2850_v14  ;;  %v3051_v8 = vld [vmem:[#allocation16_spill] sm:$0xff]  ;;  %v3052_v14 = vld [vmem:[#allocation21_spill] sm:$0xff] }
 0x14b   :  { %v1656_v5 = vld [vmem:[#allocation10 + $0x140] sm:$0xff] }
 0x14d   :  { %1458 = vmatmul.bf16.vlgmr.msra.gmra.mxu2 %v2520_v41  ;;  %v3049_v41 = vld [vmem:[#allocation20_spill] sm:$0xff] }
 0x14e   :  { %1549 = vmatpush.bf16.msrb.mxu2 %v2776_v25  ;;  %2197 = vmatpush.bf16.msra.mxu3 %v2858_v37  ;;  %v2219_v25 = vld [vmem:[#allocation2 + $0x38] sm:$0xff]  ;;  %v3054_v37 = vld [vmem:[#allocation17_spill] sm:$0xff] }
 0x14f   :  { %v1520_v32 = vrot.slane %v2219_v25, 4 }
 0x151   :  { %1598 = vmatmul.bf16.vlgmr.msra.gmra.mxu3 %v3050_v42  ;;  %v1654_v42 = vld [vmem:[#allocation10 + $0x130] sm:$0xff] }
 0x152   :  { %1550 = vmatpush.bf16.msrb.mxu2 %v2791_v47  ;;  %v1521_v47 = vsel %vm1074_vm4, %v1518_v60, %v1520_v32 }
 0x153   :  { %v1527_v50 = vpack.c.bf16 %v1520_v32, %v1521_v47  ;;  %v1653_v47 = vld [vmem:[#allocation10 + $0x128] sm:$0xff] }
 0x156   :  { %1551 = vmatpush.bf16.msrb.mxu2 %v2802_v17  ;;  %v3055_v17 = vld [vmem:[#allocation18_spill] sm:$0xff] }
 0x159   :  { %1617 = vmatmul.bf16.gmra.mxu1 %v1527_v50 }
 0x15a   :  { %1552 = vmatpush.bf16.msrb.mxu2 %v3049_v41  ;;  %v1655_v41 = vld [vmem:[#allocation10 + $0x138] sm:$0xff] }
 0x15d   :  { %1463 = vmatmul.bf16.gmra.mxu2 %v3051_v8 }
 0x15e   :  { %1553 = vmatpush.bf16.msrb.mxu2 %v3052_v14 }
 0x162   :  { %1554 = vmatpush.bf16.msrb.mxu2 %v3053_v9 }
 0x166   :  { %1664 = vmatpush.msra.mxu2 %v1663_v28 }
 0x168   :  { %1665 = vmatpush.msra.mxu2 %v1662_v34 }
 0x16a   :  { %1666 = vmatpush.msra.mxu2 %v1661_v6 }
 0x16c   :  { %1667 = vmatpush.msra.mxu2 %v1660_v23 }
 0x16d   :  { %1555 = vmatmul.bf16.vlgmr.msrb.gmra.mxu2 %v3054_v37 }
 0x16e   :  { %1668 = vmatpush.msra.mxu2 %v1659_v1 }
 0x170   :  { %1669 = vmatpush.msra.mxu2 %v1658_v7 }
 0x172   :  { %1670 = vmatpush.msra.mxu2 %v1657_v19 }
 0x174   :  { %1671 = vmatpush.msra.mxu2 %v1656_v5 }
 0x176   :  { %1672 = vmatpush.msra.mxu2 %v1655_v41 }
 0x178   :  { %1673 = vmatpush.msra.mxu2 %v1654_v42 }
 0x17a   :  { %1674 = vmatpush.msra.mxu2 %v1653_v47 }
 0x17d   :  { %1560 = vmatmul.bf16.gmra.mxu2 %v3055_v17  ;;  %v1652_v17 = vld [vmem:[#allocation10 + $0x120] sm:$0xff] }
 0x17e   :  { %v1421_v20 = vpop.f32.mrf.mxu0  ;;  %1675 = vmatpush.msra.mxu2 %v1652_v17 }
 0x17f   :  { %v1422_v11 = vadd.f32 %v2967_v2, %v1421_v20 }
 0x183   :  { %v1440_v18 = vpop.f32.mrf.mxu1 }
 0x184   :  { %v1441_v15 = vadd.f32 %v1440_v18, %v1422_v11  ;;  %v1651_v18 = vld [vmem:[#allocation10 + $0x118] sm:$0xff] }
 0x185   :  { %1676 = vmatpush.msra.mxu2 %v1651_v18  ;;  %v2211_v18 = vld [vmem:[%s3033_s8] ss:$0 sm:$0xff] }
 0x186   :  { %v1423_v49 = vpop.f32.mrf.mxu0 }
 0x187   :  { %v1424_v58 = vadd.f32 %v2967_v2, %v1423_v49  ;;  %v1650_v49 = vld [vmem:[#allocation10 + $0x110] sm:$0xff] }
 0x188   :  { %v1071_v21 = vpop.f32.mrf.mxu3  ;;  %1677 = vmatpush.msra.mxu2 %v1650_v49 }
 0x18b   :  { %v1442_v36 = vpop.f32.mrf.mxu1 }
 0x18c   :  { %v1443_v46 = vadd.f32 %v1442_v36, %v1424_v58 }
 0x18f   :  { %v2972_v10 = vpop.f32.mrf.mxu0 }
 0x193   :  { %v2970_v55 = vpop.f32.mrf.mxu1 }
 0x194   :  { %v1478_v53 = vpop.f32.mrf.mxu3 }
 0x197   :  { %v2976_v0 = vpop.f32.mrf.mxu0 }
 0x19b   :  { %v2974_v24 = vpop.f32.mrf.mxu1 }
 0x19c   :  { %v1480_v59 = vpop.f32.mrf.mxu3 }
 0x1a3   :  { %v1537_v51 = vpop.f32.mrf.mxu1 }
 0x1a4   :  { %v2978_v27 = vpop.f32.mrf.mxu3  ;;  %v1538_v63 = vadd.f32 %v2967_v2, %v1537_v51 }
 0x1a6   :  { %v2980_v22 = vpop.f32.mrf.mxu0 }
 0x1ab   :  { %v1539_v35 = vpop.f32.mrf.mxu1 }
 0x1ac   :  { %v2984_v39 = vpop.f32.mrf.mxu3  ;;  %v1540_v8 = vadd.f32 %v2967_v2, %v1539_v35  ;;  %v1649_v35 = vld [vmem:[#allocation10 + $0x108] sm:$0xff] }
 0x1ad   :  { %1678 = vmatpush.msra.mxu2 %v1649_v35 }
 0x1ae   :  { %v1499_v30 = vpop.f32.mrf.mxu0 }
 0x1b3   :  { %v1542_v44 = vpop.f32.mrf.mxu1 }
 0x1b4   :  { %v1575_v29 = vpop.f32.mrf.mxu3 }
 0x1b6   :  { %v2987_v52 = vpop.f32.mrf.mxu0 }
 0x1bb   :  { %v2991_v4 = vpop.f32.mrf.mxu1 }
 0x1bc   :  { %v1577_v26 = vpop.f32.mrf.mxu3  ;;  %v1545_v23 = vadd.f32 %v2967_v2, %v2991_v4 }
 0x1be   :  { %v2993_v62 = vpop.f32.mrf.mxu0 }
 0x1c4   :  { %v1580_v48 = vpop.f32.mrf.mxu3 }
 0x1c6   :  { %v1613_v31 = vpop.f32.mrf.mxu1  ;;  %v1594_v38 = vpop.f32.mrf.mxu0 }
 0x1c8   :  { %v1051_v33 = vpop.f32.mrf.mxu2 }
 0x1c9   :  { %v2982_v56 = vadd.f32 %v1071_v21, %v1051_v33  ;;  %v1427_v33 = vadd.f32 %v2967_v2, %v2972_v10 }
 0x1cc   :  { %v1582_v25 = vpop.f32.mrf.mxu3 }
 0x1ce   :  { %v1615_v9 = vpop.f32.mrf.mxu1  ;;  %v1596_v37 = vpop.f32.mrf.mxu0 }
 0x1d0   :  { %v1459_v16 = vpop.f32.mrf.mxu2 }
 0x1d1   :  { %v1460_v45 = vadd.f32 %v1459_v16, %v1441_v15 }
 0x1d3   :  { %v1479_v40 = vadd.f32 %v1478_v53, %v1460_v45  ;;  %v1429_v53 = vadd.f32 %v2967_v2, %v2976_v0 }
 0x1d5   :  { %v1498_v21 = vadd.f32 %v2980_v22, %v1479_v40  ;;  %v1599_v22 = vpop.f32.mrf.mxu3  ;;  %v1648_v40 = vld [vmem:[#allocation10 + $0x100] sm:$0xff] }
 0x1d6   :  { %1679 = vmatpush.msra.mxu2 %v1648_v40 }
 0x1d8   :  { %v1461_v43 = vpop.f32.mrf.mxu2 }
 0x1d9   :  { %v1462_v57 = vadd.f32 %v1461_v43, %v1443_v46  ;;  %v1507_v43 = vmax.f32 %v1498_v21, 0.0 }
 0x1db   :  { %v1481_v54 = vadd.f32 %v1480_v59, %v1462_v57  ;;  %v1543_v59 = vadd.f32 %v2967_v2, %v1542_v44  ;;  %v1448_v57 = vadd.f32 %v2974_v24, %v1429_v53  ;;  %v1618_v44 = vpop.f32.mrf.mxu1 }
 0x1dd   :  { %v1500_v15 = vadd.f32 %v1499_v30, %v1481_v54 }
 0x1df   :  { %v1508_v58 = vmax.f32 %v1500_v15, 0.0 }
 0x1e0   :  { %v2989_v61 = vpop.f32.mrf.mxu2 }
 0x1e3   :  { %v1620_v19 = vpop.f32.mrf.mxu1 }
 0x1e8   :  { %v2995_v13 = vpop.f32.mrf.mxu2 }
 0x1e9   :  { %v1467_v10 = vadd.f32 %v2995_v13, %v1448_v57 }
 0x1f0   :  { %v1556_v3 = vpop.f32.mrf.mxu2 }
 0x1f1   :  { %v1557_v60 = vadd.f32 %v1556_v3, %v1538_v63  ;;  %v1486_v63 = vadd.f32 %v2984_v39, %v1467_v10 }
 0x1f3   :  { %v1576_v12 = vadd.f32 %v1575_v29, %v1557_v60  ;;  %v1446_v29 = vadd.f32 %v2970_v55, %v1427_v33  ;;  %v1505_v13 = vadd.f32 %v2993_v62, %v1486_v63 }
 0x1f5   :  { %v1595_v32 = vadd.f32 %v1594_v38, %v1576_v12  ;;  %v1465_v34 = vadd.f32 %v2989_v61, %v1446_v29  ;;  %v1601_v38 = vpop.f32.mrf.mxu3  ;;  %v1510_v2 = vmax.f32 %v1505_v13, 0.0 }
 0x1f7   :  { %v1614_v11 = vadd.f32 %v1613_v31, %v1595_v32  ;;  %v1484_v55 = vadd.f32 %v2978_v27, %v1465_v34 }
 0x1f8   :  { %v1558_v14 = vpop.f32.mrf.mxu2 }
 0x1f9   :  { %v1559_v50 = vadd.f32 %v1558_v14, %v1540_v8  ;;  %v1623_v16 = vmax.f32 %v1614_v11, 0.0  ;;  %v1503_v60 = vadd.f32 %v2987_v52, %v1484_v55 }
 0x1fb   :  { %v1578_v20 = vadd.f32 %v1577_v26, %v1559_v50  ;;  %v1627_v54 = vadd.f32 %v1623_v16, %v1507_v43  ;;  %v1509_v41 = vmax.f32 %v1503_v60, 0.0 }
 0x1fd   :  { %v1597_v36 = vadd.f32 %v1596_v37, %v1578_v20 }
 0x1ff   :  { %v1616_v51 = vadd.f32 %v1615_v9, %v1597_v36 }
 0x200   :  { %v1561_v45 = vpop.f32.mrf.mxu2 }
 0x201   :  { %v1624_v30 = vmax.f32 %v1616_v51, 0.0  ;;  %v1562_v46 = vadd.f32 %v1561_v45, %v1543_v59 }
 0x203   :  { %v1628_v0 = vadd.f32 %v1624_v30, %v1508_v58  ;;  %v1581_v26 = vadd.f32 %v1580_v48, %v1562_v46 }
 0x205   :  { %v1631_v28 = vsel %vm1074_vm4, %v1628_v0, -inf  ;;  %v1600_v1 = vadd.f32 %v1599_v22, %v1581_v26 }
 0x206   :  { %v1632_v6 = vmax.f32 %v1627_v54, %v1631_v28 }
 0x207   :  { %v1619_v48 = vadd.f32 %v1618_v44, %v1600_v1 }
 0x208   :  { %v1563_v24 = vpop.f32.mrf.mxu2  ;;  %v1633_v61 = vrot.slane %v1632_v6, 4 }
 0x209   :  { %v1564_v31 = vadd.f32 %v1563_v24, %v1545_v23  ;;  %v1625_v5 = vmax.f32 %v1619_v48, 0.0 }
 0x20a   :  { %v1634_v42 = vmax.f32 %v1632_v6, %v1633_v61 }
 0x20b   :  { %v1583_v3 = vadd.f32 %v1582_v25, %v1564_v31  ;;  %v1629_v8 = vadd.f32 %v1625_v5, %v1509_v41 }
 0x20c   :  { %v1635_v32 = vrot.slane %v1634_v42, 2 }
 0x20d   :  { %v1602_v7 = vadd.f32 %v1601_v38, %v1583_v3 }
 0x20e   :  { %v1636_v47 = vmax.f32 %v1634_v42, %v1635_v32 }
 0x20f   :  { %v1621_v12 = vadd.f32 %v1620_v19, %v1602_v7 }
 0x210   :  { %v1637_v9 = vrot.slane %v1636_v47, 1 }
 0x211   :  { %v1626_v4 = vmax.f32 %v1621_v12, 0.0 }
 0x212   :  { %v1638_v17 = vmax.f32 %v1636_v47, %v1637_v9 }
 0x213   :  { %v1630_v39 = vadd.f32 %v1626_v4, %v1510_v2 }
 0x215   :  { %v1639_v27 = vsel %vm1074_vm4, %v1630_v39, -inf }
 0x216   :  { %v1640_v25 = vmax.f32 %v1629_v8, %v1639_v27 }
 0x218   :  { %v1641_v14 = vrot.slane %v1640_v25, 4 }
 0x21a   :  { %v1642_v62 = vmax.f32 %v1640_v25, %v1641_v14 }
 0x21c   :  { %v1643_v50 = vrot.slane %v1642_v62, 2 }
 0x21e   :  { %v1644_v52 = vmax.f32 %v1642_v62, %v1643_v50 }
 0x220   :  { %v1645_v37 = vrot.slane %v1644_v52, 1 }
 0x222   :  { %v1646_v20 = vmax.f32 %v1644_v52, %v1645_v37 }
 0x224   :  { %v1647_v11 = vsel %vm528_vm3, %v1638_v17, %v1646_v20 }
 0x225   :  { %1680 = vmatmul.f32.vlgmr.msra.gmra.mxu2 %v1647_v11 }
 0x2a8   :  { %v1681_v15 = vpop.f32.mrf.mxu2 }
 0x2a9   :  { %v1684_v36 = vadd.f32 %v1681_v15, %v2982_v56 }
 0x2ab   :  { %v1689_v21 = vadd.f32 %v2211_v18, %v1684_v36 }
 0x2ad   :  { %1690 = vst [vmem:[#allocation11] sm:$0x3] %v1689_v21 }
 0x2ae   :  { %1701 = dma.vmem_to_hbm [thread:$0]  %s1697_s18, 32, %s1699_s21, [#allocation4]  }
 0x2af   :  { %2370 = dma.done.wait [#allocation4], 32  }
 0x2b0   :  { %2371 = vsyncadd [#allocation4], 4294967264 }
 0x2b1   :  { %1706 = vsyncpa [#allocation3], 1 }
 0x2b2   :  { %1707 = vsyncpa [#allocation6], 1 }
 0x2b3   :  { %1708 = vsyncpa [#allocation9], 1 }
 0x2b4   :  { %1709 = vsyncpa [#allocation4], 1 }

</bundles_post_ra>
